<compile_context>
chip_gen: v7x
topology: tpu7x:2x2x1
jax: 0.10.0
libtpu: 0.0.40
codegen_flags: <defaults>
</compile_context>

<pallas_src>
import functools

import numpy as np
import jax
import jax.numpy as jnp
from jax.experimental import pallas as pl
from jax.experimental.pallas import tpu as pltpu


def _round_up(x, m):
    return ((x + m - 1) // m) * m


def _map_fft_mse_kernel(p_ref, l_ref, cs_ref, osq_ref, olm_ref, *,
                        k_pad, precision):
    """One grid step handles a (row_tile, T) slab of preds and labels.

    cs_ref is the fused [cos | sin] DFT matrix (T, 2*k_pad) restricted to the
    selected frequency band (zero-padded columns).  One matmul per input gives
    the band-limited rfft real|imag halves; per-tile partial sums of the
    squared spectral error and of the label magnitude are written as
    lane-dense (1, k_pad) rows into this tile's own output block.
    """
    p = p_ref[...]                       # (rt, T)
    l = l_ref[...]                       # (rt, T)
    cs = cs_ref[...]                     # (T, 2*k_pad) = [cos | sin]

    pf = jnp.dot(p, cs, preferred_element_type=jnp.float32, precision=precision)
    lf = jnp.dot(l, cs, preferred_element_type=jnp.float32, precision=precision)

    pr, pi = pf[:, :k_pad], pf[:, k_pad:]      # lane-tile-aligned slices
    lr, li = lf[:, :k_pad], lf[:, k_pad:]

    p_mag = jnp.sqrt(pr * pr + pi * pi)        # |rfft(preds)| on band (padded)
    l_mag = jnp.sqrt(lr * lr + li * li)        # |rfft(labels)|
    diff = p_mag - l_mag

    # Sublane-only partial reduction; padded lanes/rows are exactly zero.
    sq_part = jnp.sum(diff * diff, axis=0, keepdims=True)   # (1, k_pad)
    lm_part = jnp.sum(l_mag, axis=0, keepdims=True)         # (1, k_pad)
    osq_ref[...] = sq_part[None]                             # (1, 1, k_pad)
    olm_ref[...] = lm_part[None]


def map_fft_mse(preds, labels, fps, f_min, f_max, *,
                row_tile=256, compute_dtype=None):
    """Pallas implementation of MapFFTMSE.forward."""
    B, C, H, T = preds.shape
    N = B * C * H

    # Frequency-band selection on the host, exactly like the reference
    # (fps[0] is used; indices come from numpy).
    fps0 = float(np.asarray(fps)[0])
    f = np.fft.rfftfreq(T, 1.0 / fps0)
    indices = np.arange(len(f))[(f >= f_min) & (f <= f_max)]
    K = int(len(indices))
    assert K > 0, "empty frequency band"

    if compute_dtype is None:
        compute_dtype = (jnp.bfloat16 if preds.dtype == jnp.bfloat16
                         else jnp.float32)
    compute_dtype = jnp.dtype(compute_dtype)
    # Mosaic dot lowering supports DEFAULT / HIGHEST only; f32 -> HIGHEST
    # (accurate), bf16 -> single native MXU pass with f32 accumulation.
    precision = (jax.lax.Precision.HIGHEST
                 if compute_dtype == jnp.dtype(jnp.float32) else None)

    # Fused, lane-padded [cos | sin] DFT matrix for the selected bins.
    k_pad = _round_up(K, 128)
    t = np.arange(T, dtype=np.float64)[:, None]
    kk = indices.astype(np.float64)[None, :]
    ang = 2.0 * np.pi * t * kk / T
    cs_np = np.zeros((T, 2 * k_pad), dtype=np.float32)
    cs_np[:, :K] = np.cos(ang)
    cs_np[:, k_pad:k_pad + K] = np.sin(ang)      # sign irrelevant for |.|
    cs = jnp.asarray(cs_np, dtype=compute_dtype)

    p2 = preds.reshape(N, T).astype(compute_dtype)
    l2 = labels.reshape(N, T).astype(compute_dtype)

    # Row tiling: as large as possible (default 256), rounded to 8, and
    # clamped so double-buffered tiles + the DFT matrix fit a ~24 MiB budget.
    itemsize = compute_dtype.itemsize
    budget = 24 * 1024 * 1024
    cs_bytes = 2 * (T * 2 * k_pad * itemsize)        # conservatively x2 bufs
    per_row = 2 * 2 * T * itemsize                   # preds+labels, x2 bufs
    max_rt = max(8, (budget - cs_bytes) // per_row)
    rt = max(8, min(int(row_tile), int(max_rt), _round_up(N, 8)))
    rt = _round_up(rt, 8)
    n_pad = _round_up(N, rt)
    if n_pad != N:
        p2 = jnp.pad(p2, ((0, n_pad - N), (0, 0)))   # zero rows contribute 0
        l2 = jnp.pad(l2, ((0, n_pad - N), (0, 0)))
    num_tiles = n_pad // rt

    kernel = functools.partial(_map_fft_mse_kernel, k_pad=k_pad,
                               precision=precision)

    out_sq, out_lm = pl.pallas_call(
        kernel,
        out_shape=(
            jax.ShapeDtypeStruct((num_tiles, 1, k_pad), jnp.float32),
            jax.ShapeDtypeStruct((num_tiles, 1, k_pad), jnp.float32),
        ),
        grid_spec=pltpu.PrefetchScalarGridSpec(
            num_scalar_prefetch=0,
            grid=(num_tiles,),
            in_specs=[
                pl.BlockSpec((rt, T), lambda i: (i, 0)),
                pl.BlockSpec((rt, T), lambda i: (i, 0)),
                pl.BlockSpec((T, 2 * k_pad), lambda i: (0, 0)),
            ],
            out_specs=(
                pl.BlockSpec((1, 1, k_pad), lambda i: (i, 0, 0)),
                pl.BlockSpec((1, 1, k_pad), lambda i: (i, 0, 0)),
            ),
        ),
        compiler_params=pltpu.CompilerParams(
            dimension_semantics=("parallel",)),
    )(p2, l2, cs)

    # Tiny final reduction + divides in plain JAX (parallel-grid friendly).
    sum_sq = jnp.sum(out_sq)
    sum_lm = jnp.sum(out_lm)
    mse = sum_sq / jnp.float32(N * K)        # MSELoss mean over original N*K
    power = sum_lm / jnp.float32(N)          # sum(label_mag[band]) / (B*C*H)
    return mse / power


def _reference(preds, labels, fps, f_min, f_max):
    """Pure-JAX reference mirroring the PyTorch forward."""
    B, C, H, T = preds.shape
    preds_fft = jnp.abs(jnp.fft.rfft(preds, axis=3))
    labels_fft = jnp.abs(jnp.fft.rfft(labels, axis=3))
    f = np.fft.rfftfreq(T, 1.0 / float(np.asarray(fps)[0]))
    idx = np.arange(len(f))[(f >= f_min) & (f <= f_max)]
    pf = preds_fft[:, :, :, idx]
    lf = labels_fft[:, :, :, idx]
    loss = jnp.mean((pf - lf) ** 2)
    power = jnp.sum(lf) / (B * C * H)
    return loss / power


if __name__ == "__main__":
    key = jax.random.PRNGKey(0)
    k1, k2 = jax.random.split(key)

    # (batch, channels, spatial, time); T=64 so the 0.5-3 Hz band at 30 fps
    # contains 5 rfft bins (matching the module's intended use).
    B, C, H, T = 2, 4, 16, 64
    preds = jax.random.normal(k1, (B, C, H, T), dtype=jnp.float32)
    labels = jax.random.normal(k2, (B, C, H, T), dtype=jnp.float32)
    fps = jnp.full((B,), 30.0, dtype=jnp.float32)   # sampling rate per sample
    f_min, f_max = 0.5, 3.0                         # typical rPPG band (Hz)

    ref = jax.block_until_ready(_reference(preds, labels, fps, f_min, f_max))

    # f32 / HIGHEST path (N = 128 rows -> a single 128-row tile).
    loss = jax.block_until_ready(map_fft_mse(preds, labels, fps, f_min, f_max))
    np.testing.assert_allclose(np.asarray(loss), np.asarray(ref),
                               rtol=2e-3, atol=1e-5)

    print("KERNEL_OK")
</pallas_src>

<mosaic_0001>
module attributes {stable_mosaic.version = 11 : i64} {
  func.func @_map_fft_mse_kernel(%arg0: i32, %arg1: memref<128x64xf32, #tpu.memory_space<vmem>>, %arg2: memref<128x64xf32, #tpu.memory_space<vmem>>, %arg3: memref<64x256xf32, #tpu.memory_space<vmem>>, %arg4: memref<1x1x128xf32, #tpu.memory_space<vmem>>, %arg5: memref<1x1x128xf32, #tpu.memory_space<vmem>>) attributes {dimension_semantics = [#tpu.dimension_semantics<parallel>], iteration_bounds = array<i64: 1>, scalar_prefetch = 0 : i64, scratch_operands = 0 : i64, tpu.core_type = #tpu.core_type<tc>, window_params = [{transform_indices = @transform_0, window_bounds = array<i64: 128, 64>}, {transform_indices = @transform_1, window_bounds = array<i64: 128, 64>}, {pipeline_mode = #tpu.pipeline_mode<synchronous>, transform_indices = @transform_2, window_bounds = array<i64: 64, 256>}, {transform_indices = @transform_3, window_bounds = array<i64: 1, 1, 128>}, {transform_indices = @transform_4, window_bounds = array<i64: 1, 1, 128>}]} {
    %c0 = arith.constant 0 : index
    %c0_0 = arith.constant 0 : index
    %0 = vector.load %arg1[%c0, %c0_0] : memref<128x64xf32, #tpu.memory_space<vmem>>, vector<128x64xf32>
    %c0_1 = arith.constant 0 : index
    %c0_2 = arith.constant 0 : index
    %1 = vector.load %arg2[%c0_1, %c0_2] : memref<128x64xf32, #tpu.memory_space<vmem>>, vector<128x64xf32>
    %c0_3 = arith.constant 0 : index
    %c0_4 = arith.constant 0 : index
    %2 = vector.load %arg3[%c0_3, %c0_4] : memref<64x256xf32, #tpu.memory_space<vmem>>, vector<64x256xf32>
    %cst = arith.constant dense<0.000000e+00> : vector<128x256xf32>
    %3 = tpu.matmul %0, %2, %cst {dimension_numbers = #tpu.dot_dimension_numbers<[1], [0], [0], [1], [0, 0, 1, 1], [], []>, precision = #tpu.contract_precision<fp32>} : vector<128x64xf32>, vector<64x256xf32>, vector<128x256xf32> -> vector<128x256xf32>
    %cst_5 = arith.constant dense<0.000000e+00> : vector<128x256xf32>
    %4 = tpu.matmul %1, %2, %cst_5 {dimension_numbers = #tpu.dot_dimension_numbers<[1], [0], [0], [1], [0, 0, 1, 1], [], []>, precision = #tpu.contract_precision<fp32>} : vector<128x64xf32>, vector<64x256xf32>, vector<128x256xf32> -> vector<128x256xf32>
    %5 = vector.extract_strided_slice %3 {offsets = [0, 0], sizes = [128, 128], strides = [1, 1]} : vector<128x256xf32> to vector<128x128xf32>
    %6 = vector.extract_strided_slice %3 {offsets = [0, 128], sizes = [128, 128], strides = [1, 1]} : vector<128x256xf32> to vector<128x128xf32>
    %7 = vector.extract_strided_slice %4 {offsets = [0, 0], sizes = [128, 128], strides = [1, 1]} : vector<128x256xf32> to vector<128x128xf32>
    %8 = vector.extract_strided_slice %4 {offsets = [0, 128], sizes = [128, 128], strides = [1, 1]} : vector<128x256xf32> to vector<128x128xf32>
    %9 = arith.mulf %5, %5 : vector<128x128xf32>
    %10 = arith.mulf %6, %6 : vector<128x128xf32>
    %11 = arith.addf %9, %10 : vector<128x128xf32>
    %12 = math.sqrt %11 : vector<128x128xf32>
    %13 = arith.mulf %7, %7 : vector<128x128xf32>
    %14 = arith.mulf %8, %8 : vector<128x128xf32>
    %15 = arith.addf %13, %14 : vector<128x128xf32>
    %16 = math.sqrt %15 : vector<128x128xf32>
    %17 = arith.subf %12, %16 : vector<128x128xf32>
    %18 = arith.mulf %17, %17 : vector<128x128xf32>
    %cst_6 = arith.constant dense<0.000000e+00> : vector<128xf32>
    %19 = vector.multi_reduction <add>, %18, %cst_6 [0] : vector<128x128xf32> to vector<128xf32>
    %20 = vector.shape_cast %19 : vector<128xf32> to vector<1x128xf32>
    %cst_7 = arith.constant dense<0.000000e+00> : vector<128xf32>
    %21 = vector.multi_reduction <add>, %16, %cst_7 [0] : vector<128x128xf32> to vector<128xf32>
    %22 = vector.shape_cast %21 : vector<128xf32> to vector<1x128xf32>
    %23 = vector.shape_cast %20 : vector<1x128xf32> to vector<1x1x128xf32>
    %c0_8 = arith.constant 0 : index
    %c0_9 = arith.constant 0 : index
    %c0_10 = arith.constant 0 : index
    %24 = vector.load %arg4[%c0_8, %c0_9, %c0_10] : memref<1x1x128xf32, #tpu.memory_space<vmem>>, vector<1x1x128xf32>
    tpu.vector_store %arg4[%c0_8, %c0_9, %c0_10], %23 {strides = array<i32>} : memref<1x1x128xf32, #tpu.memory_space<vmem>>, vector<1x1x128xf32>,
    %25 = vector.shape_cast %22 : vector<1x128xf32> to vector<1x1x128xf32>
    %c0_11 = arith.constant 0 : index
    %c0_12 = arith.constant 0 : index
    %c0_13 = arith.constant 0 : index
    %26 = vector.load %arg5[%c0_11, %c0_12, %c0_13] : memref<1x1x128xf32, #tpu.memory_space<vmem>>, vector<1x1x128xf32>
    tpu.vector_store %arg5[%c0_11, %c0_12, %c0_13], %25 {strides = array<i32>} : memref<1x1x128xf32, #tpu.memory_space<vmem>>, vector<1x1x128xf32>,
    return
  }
  func.func @transform_0(%arg0: i32) -> (i32, i32) {
    %c0_i32 = arith.constant 0 : i32
    %c0_i32_0 = arith.constant 0 : i32
    return %arg0, %c0_i32 : i32, i32
  }
  func.func @transform_1(%arg0: i32) -> (i32, i32) {
    %c0_i32 = arith.constant 0 : i32
    %c0_i32_0 = arith.constant 0 : i32
    return %arg0, %c0_i32 : i32, i32
  }
  func.func @transform_2(%arg0: i32) -> (i32, i32) {
    %c0_i32 = arith.constant 0 : i32
    %c0_i32_0 = arith.constant 0 : i32
    %c0_i32_1 = arith.constant 0 : i32
    return %c0_i32, %c0_i32_0 : i32, i32
  }
  func.func @transform_3(%arg0: i32) -> (i32, i32, i32) {
    %c0_i32 = arith.constant 0 : i32
    %c0_i32_0 = arith.constant 0 : i32
    %c0_i32_1 = arith.constant 0 : i32
    return %arg0, %c0_i32, %c0_i32_0 : i32, i32, i32
  }
  func.func @transform_4(%arg0: i32) -> (i32, i32, i32) {
    %c0_i32 = arith.constant 0 : i32
    %c0_i32_0 = arith.constant 0 : i32
    %c0_i32_1 = arith.constant 0 : i32
    return %arg0, %c0_i32, %c0_i32_0 : i32, i32, i32
  }
}

</mosaic_0001>

<bundles_post_ra>
// kernel: tpu_custom_call.1
= control target key start
LH: loop header
LB: loop body
LE: loop exit
PB: predicated region body
PF: predicated region fallthrough
CT: control target
= control target key end

     0   :  { %10 = vsyncpa [#allocation3], 0  ;;  %vm66_vm0 = vcmask 523264   ;;  %v5722_v9 = vmov 0.0   ;;  %s5689_s0 = inlined_call_operand.vmem [shape: f32[128,64], index: 0, kind: input, shape index: {}]   ;;  %s5690_s1 = inlined_call_operand.vmem [shape: f32[128,64], index: 1, kind: input, shape index: {}]   ;;  %s5691_s2 = inlined_call_operand.vmem [shape: f32[64,256], index: 2, kind: input, shape index: {}]   ;;  %s5692_s3 = inlined_call_operand.hbm [shape: f32[1,1,128], index: 3, kind: output, shape index: {0}]   ;;  %s5693_s4 = inlined_call_operand.hbm [shape: f32[1,1,128], index: 4, kind: output, shape index: {1}]  }
   0x1   :  { %v51_v0 = vld [vmem:[%s5691_s2 + $0x8] sm:$0xff]  ;;  %v53_v1 = vld [vmem:[%s5691_s2 + $0x18] sm:$0xff]  ;;  %v50_v2 = vld [vmem:[%s5691_s2] sm:$0xff]  ;;  %195 = vmatprep.mubr.f32.mxu0 %v5722_v9  ;;  %1625 = vmatprep.mubr.f32.mxu1 %v5722_v9 }
   0x2   :  { %v115_v3 = vand.u32 4294901760, %v51_v0  ;;  %v119_v4 = vand.u32 4294901760, %v53_v1  ;;  %v52_v5 = vld [vmem:[%s5691_s2 + $0x10] sm:$0xff]  ;;  %v117_v6 = vand.u32 4294901760, %v50_v2  ;;  %v4021_v7 = vld [vmem:[%s5691_s2 + $0x28] sm:$0xff]  ;;  %v4026_v8 = vld [vmem:[%s5691_s2 + $0x38] sm:$0xff] }
   0x3   :  { %v121_v10 = vand.u32 4294901760, %v52_v5  ;;  %v123_v11 = vand.u32 4294901760, %v4021_v7  ;;  %v127_v12 = vand.u32 4294901760, %v4026_v8  ;;  %v4035_v13 = vld [vmem:[%s5691_s2 + $0x20] sm:$0xff]  ;;  %v4040_v14 = vld [vmem:[%s5691_s2 + $0x30] sm:$0xff]  ;;  %v4045_v15 = vld [vmem:[%s5691_s2 + $0x48] sm:$0xff] }
   0x4   :  { %v4047_v16 = vpack.c.bf16 %v119_v4, %v115_v3  ;;  %v125_v17 = vand.u32 4294901760, %v4035_v13  ;;  %v129_v18 = vand.u32 4294901760, %v4040_v14  ;;  %v4054_v19 = vld [vmem:[%s5691_s2 + $0x58] sm:$0xff]  ;;  %v5716_v20 = vand.u32 4294901760, %v4045_v15  ;;  %v4060_v21 = vld [vmem:[%s5691_s2 + $0x40] sm:$0xff]  ;;  %v4065_v22 = vld [vmem:[%s5691_s2 + $0x50] sm:$0xff] }
   0x5   :  { %v4067_v23 = vpack.c.bf16 %v121_v10, %v117_v6  ;;  %v4073_v24 = vpack.c.bf16 %v127_v12, %v123_v11  ;;  %v5715_v25 = vand.u32 4294901760, %v4054_v19  ;;  %v5714_v26 = vand.u32 4294901760, %v4060_v21  ;;  %v4080_v27 = vld [vmem:[%s5691_s2 + $0x68] sm:$0xff]  ;;  %v4085_v28 = vld [vmem:[%s5691_s2 + $0x78] sm:$0xff]  ;;  %v4090_v29 = vld [vmem:[%s5691_s2 + $0x60] sm:$0xff] }
   0x6   :  { %3352 = vmatprep.subr.bf16.mxu0 %v4047_v16  ;;  %3448 = vmatprep.subr.bf16.mxu1 %v4047_v16  ;;  %v4098_v30 = vpack.c.bf16 %v129_v18, %v125_v17  ;;  %v5710_v31 = vand.u32 4294901760, %v4065_v22  ;;  %v5706_v32 = vand.u32 4294901760, %v4080_v27  ;;  %v5705_v33 = vand.u32 4294901760, %v4085_v28  ;;  %v4106_v34 = vld [vmem:[%s5691_s2 + $0x70] sm:$0xff]  ;;  %v18_v35 = vld [vmem:[%s5689_s0] sm:$0xff]  ;;  %v19_v45 = vld [vmem:[%s5689_s0 + $0x8] sm:$0xff] }
   0x7   :  { %5872 = vst [vmem:[#allocation8_spill] sm:$0xff] %v4067_v23  ;;  %5873 = vst [vmem:[#allocation9_spill] sm:$0xff] %v4073_v24  ;;  %v34_v36 = vld [vmem:[%s5690_s1] sm:$0xff]  ;;  %3354 = vmatpush1.bf16.msra.mxu0 %v4067_v23  ;;  %3450 = vmatpush1.bf16.msra.mxu1 %v4067_v23  ;;  %v4120_v37 = vpack.c.bf16 %v5715_v25, %v5716_v20  ;;  %v5703_v38 = vand.u32 4294901760, %v4090_v29  ;;  %v5700_v39 = vand.u32 4294901760, %v4106_v34  ;;  %v68_v40 = vsel %vm66_vm0, %v18_v35, 0 }
   0x8   :  { %5874 = vst [vmem:[#allocation10_spill] sm:$0xff] %v4098_v30  ;;  %3356 = vmatprep.subr.bf16.mxu0 %v4073_v24  ;;  %3452 = vmatprep.subr.bf16.mxu1 %v4073_v24  ;;  %v4131_v41 = vpack.c.bf16 %v5710_v31, %v5714_v26  ;;  %v4137_v42 = vpack.c.bf16 %v5705_v33, %v5706_v32  ;;  %v4139_v43 = vand.u32 4294901760, %v68_v40  ;;  %v35_v46 = vld [vmem:[%s5690_s1 + $0x8] sm:$0xff]  ;;  %v1498_v49 = vsel %vm66_vm0, %v34_v36, 0 }
   0x9   :  { %5875 = vst [vmem:[#allocation11_spill] sm:$0xff] %v4120_v37  ;;  %v4141_v44 = vsub.f32 %v51_v0, %v115_v3  ;;  %v4153_v47 = vpack.c.bf16 %v5700_v39, %v5703_v38  ;;  %v4155_v48 = vsub.f32 %v53_v1, %v119_v4  ;;  %v4158_v50 = vsub.f32 %v50_v2, %v117_v6  ;;  %v20_v3 = vld [vmem:[%s5689_s0 + $0x10] sm:$0xff] }
   0xa   :  { %5876 = vst [vmem:[#allocation12_spill] sm:$0xff] %v4131_v41  ;;  %5877 = vst [vmem:[#allocation13_spill] sm:$0xff] %v4137_v42  ;;  %v4161_v51 = vsub.f32 %v68_v40, %v4139_v43  ;;  %v4164_v53 = vand.u32 4294901760, %v1498_v49  ;;  %v4166_v54 = vsub.f32 %v52_v5, %v121_v10  ;;  %v71_v57 = vsel %vm66_vm0, %v19_v45, 0 }
   0xb   :  { %5878 = vst [vmem:[#allocation14_spill] sm:$0xff] %v4153_v47  ;;  %v5699_v52 = vand.u32 4294901760, %v4141_v44  ;;  %3358 = vmatpush1.bf16.msra.mxu0 %v4098_v30  ;;  %3454 = vmatpush1.bf16.msra.mxu1 %v4098_v30  ;;  %v5697_v55 = vand.u32 4294901760, %v4155_v48  ;;  %v5696_v56 = vand.u32 4294901760, %v4158_v50  ;;  %v1501_v58 = vsel %vm66_vm0, %v35_v46, 0  ;;  %v36_v46 = vld [vmem:[%s5690_s1 + $0x10] sm:$0xff] }
   0xc   :  { %5879 = vst [vmem:[#allocation15_spill] sm:$0xff] %v4161_v51  ;;  %3360 = vmatprep.subr.bf16.mxu0 %v4120_v37  ;;  %3456 = vmatprep.subr.bf16.mxu1 %v4120_v37  ;;  %v5694_v59 = vand.u32 4294901760, %v4161_v51  ;;  %v4181_v61 = vsub.f32 %v1498_v49, %v4164_v53  ;;  %v5695_v62 = vand.u32 4294901760, %v4166_v54  ;;  %v4190_v1 = vand.u32 4294901760, %v71_v57  ;;  %v21_v49 = vld [vmem:[%s5689_s0 + $0x18] sm:$0xff] }
   0xd   :  { %v375_v60 = vsub.f32 %v4141_v44, %v5699_v52  ;;  %v387_v63 = vsub.f32 %v4155_v48, %v5697_v55  ;;  %v381_v0 = vsub.f32 %v4158_v50, %v5696_v56  ;;  %v4192_v2 = vand.u32 4294901760, %v1501_v58 }
   0xe   :  { %5880 = vst [vmem:[#allocation16_spill] sm:$0xff] %v4181_v61  ;;  %v199_v4 = vsub.f32 %v4161_v51, %v5694_v59  ;;  %v5698_v6 = vand.u32 4294901760, %v4181_v61  ;;  %v393_v10 = vsub.f32 %v4166_v54, %v5695_v62  ;;  %v4207_v40 = vsub.f32 %v71_v57, %v4190_v1 }
   0xf   :  { %v376_v5 = vand.u32 4294901760, %v375_v60  ;;  %3362 = vmatpush1.bf16.msra.mxu0 %v4131_v41  ;;  %3458 = vmatpush1.bf16.msra.mxu1 %v4131_v41  ;;  %v388_v35 = vand.u32 4294901760, %v387_v63  ;;  %v382_v36 = vand.u32 4294901760, %v381_v0  ;;  %v4210_v45 = vsub.f32 %v1501_v58, %v4192_v2  ;;  %v37_v0 = vld [vmem:[%s5690_s1 + $0x18] sm:$0xff] }
  0x10   :  { %5881 = vst [vmem:[#allocation17_spill] sm:$0xff] %v4207_v40  ;;  %3364 = vmatprep.subr.bf16.mxu0 %v4137_v42  ;;  %3460 = vmatprep.subr.bf16.mxu1 %v4137_v42  ;;  %v200_v60 = vand.u32 4294901760, %v199_v4  ;;  %v1629_v57 = vsub.f32 %v4181_v61, %v5698_v6  ;;  %v394_v63 = vand.u32 4294901760, %v393_v10  ;;  %v74_v58 = vsel %vm66_vm0, %v20_v3, 0  ;;  %v22_v4 = vld [vmem:[%s5689_s0 + $0x20] sm:$0xff] }
  0x11   :  { %5882 = vst [vmem:[#allocation18_spill] sm:$0xff] %v4210_v45  ;;  %v3367_v59 = vpack.c.bf16 %v388_v35, %v376_v5  ;;  %v5702_v62 = vand.u32 4294901760, %v4207_v40  ;;  %v5701_v56 = vand.u32 4294901760, %v4210_v45  ;;  %v4229_v55 = vand.u32 4294901760, %v74_v58 }
  0x13   :  { %5883 = vst [vmem:[#allocation19_spill] sm:$0xff] %v4229_v55 }
  0x14   :  { %11 = vsyncpa [#allocation5], 0  ;;  %v1630_v6 = vand.u32 4294901760, %v1629_v57  ;;  %v3369_v10 = vpack.c.bf16 %v394_v63, %v382_v36  ;;  %v1504_v3 = vsel %vm66_vm0, %v36_v46, 0  ;;  %v77_v52 = vsel %vm66_vm0, %v21_v49, 0  ;;  %3366 = vmatpush1.bf16.msra.mxu0 %v4153_v47  ;;  %3462 = vmatpush1.bf16.msra.mxu1 %v4153_v47  ;;  %s3980_s30 = smov [#allocation2]  }
  0x15   :  { %v210_v5 = vsub.f32 %v4207_v40, %v5702_v62  ;;  %v1640_v35 = vsub.f32 %v4210_v45, %v5701_v56  ;;  %v4245_v39 = vsub.f32 %v74_v58, %v4229_v55  ;;  %v4247_v36 = vand.u32 4294901760, %v1504_v3  ;;  %3368 = vmatprep.subr.bf16.mxu0 %v3367_v59  ;;  %3464 = vmatprep.subr.bf16.mxu1 %v3367_v59  ;;  %v38_v58 = vld [vmem:[%s5690_s1 + $0x20] sm:$0xff]  ;;  %s3329_s5 = sshll.u32 %s3980_s30, 4  ;;  %s5657_s5 = int_to_ptr.vmem [resolvable:$true] %s3329_s5 }
  0x16   :  { %v4249_v46 = vand.u32 4294901760, %v77_v52  ;;  %v1507_v49 = vsel %vm66_vm0, %v37_v0, 0  ;;  %v80_v57 = vsel %vm66_vm0, %v22_v4, 0  ;;  %v4256_v63 = vsub.f32 %v4021_v7, %v123_v11 }
  0x17   :  { %5884 = vst [vmem:[#allocation20_spill] sm:$0xff] %v4245_v39  ;;  %5885 = vst [vmem:[#allocation21_spill] sm:$0xff] %v4247_v36  ;;  %v211_v56 = vand.u32 4294901760, %v210_v5  ;;  %v1641_v62 = vand.u32 4294901760, %v1640_v35  ;;  %v5704_v38 = vand.u32 4294901760, %v4245_v39  ;;  %v4263_v59 = vsub.f32 %v1504_v3, %v4247_v36  ;;  %201 = vmatmul.mubr.f32.vlgmr.msra.gmra.mrb[0].mxu0 %v200_v60  ;;  %1631 = vmatmul.mubr.f32.vlgmr.msra.gmra.mrb[0].mxu1 %v1630_v6 }
  0x18   :  { %5886 = vst [vmem:[#allocation22_spill] sm:$0xff] %v4249_v46  ;;  %v4266_v0 = vsub.f32 %v77_v52, %v4249_v46  ;;  %v4268_v4 = vand.u32 4294901760, %v1507_v49  ;;  %v4270_v7 = vand.u32 4294901760, %v80_v57  ;;  %v5707_v11 = vand.u32 4294901760, %v4256_v63  ;;  %3370 = vmatpush1.bf16.msra.mxu0 %v3369_v10  ;;  %3466 = vmatpush1.bf16.msra.mxu1 %v3369_v10 }
  0x19   :  { %5887 = vst [vmem:[#allocation23_spill] sm:$0xff] %v4263_v59  ;;  %v221_v5 = vsub.f32 %v4245_v39, %v5704_v38  ;;  %v5708_v3 = vand.u32 4294901760, %v4263_v59  ;;  %v4280_v6 = vsub.f32 %v4026_v8, %v127_v12  ;;  %v1510_v52 = vsel %vm66_vm0, %v38_v58, 0  ;;  %206 = vmatprep.mubr.f32.mxu0 %v5722_v9  ;;  %1636 = vmatprep.mubr.f32.mxu1 %v5722_v9 }
  0x1a   :  { %5888 = vst [vmem:[#allocation24_spill] sm:$0xff] %v4266_v0  ;;  %5889 = vst [vmem:[#allocation25_spill] sm:$0xff] %v4268_v4  ;;  %v5709_v60 = vand.u32 4294901760, %v4266_v0  ;;  %v4287_v10 = vsub.f32 %v1507_v49, %v4268_v4  ;;  %v4290_v35 = vsub.f32 %v80_v57, %v4270_v7  ;;  %v399_v38 = vsub.f32 %v4256_v63, %v5707_v11 }
  0x1b   :  { %5890 = vst [vmem:[#allocation26_spill] sm:$0xff] %v4270_v7  ;;  %v222_v8 = vand.u32 4294901760, %v221_v5  ;;  %v1651_v12 = vsub.f32 %v4263_v59, %v5708_v3  ;;  %v5711_v58 = vand.u32 4294901760, %v4280_v6  ;;  %v4299_v33 = vand.u32 4294901760, %v1510_v52  ;;  %212 = vmatmul.mubr.f32.gmra.mrb[2].mxu0 %v211_v56  ;;  %1642 = vmatmul.mubr.f32.gmra.mrb[2].mxu1 %v1641_v62  ;;  %v23_v5 = vld [vmem:[%s5689_s0 + $0x28] sm:$0xff] }
  0x1c   :  { %5891 = vst [vmem:[#allocation27_spill] sm:$0xff] %v4287_v10  ;;  %5892 = vst [vmem:[#allocation28_spill] sm:$0xff] %v4290_v35  ;;  %v232_v49 = vsub.f32 %v4266_v0, %v5709_v60  ;;  %v5712_v57 = vand.u32 4294901760, %v4287_v10  ;;  %v5713_v32 = vand.u32 4294901760, %v4290_v35  ;;  %v400_v11 = vand.u32 4294901760, %v399_v38  ;;  %217 = vmatprep.mubr.f32.mxu0 %v5722_v9  ;;  %1647 = vmatprep.mubr.f32.mxu1 %v5722_v9 }
  0x1d   :  { %5893 = vst [vmem:[#allocation29_spill] sm:$0xff] %v4299_v33  ;;  %v1652_v3 = vand.u32 4294901760, %v1651_v12  ;;  %v411_v56 = vsub.f32 %v4280_v6, %v5711_v58  ;;  %v4315_v62 = vsub.f32 %v1510_v52, %v4299_v33  ;;  %v4320_v38 = vsub.f32 %v4035_v13, %v125_v17  ;;  %v39_v52 = vld [vmem:[%s5690_s1 + $0x28] sm:$0xff] }
  0x1e   :  { %v233_v60 = vand.u32 4294901760, %v232_v49  ;;  %v1662_v31 = vsub.f32 %v4287_v10, %v5712_v57  ;;  %v243_v12 = vsub.f32 %v4290_v35, %v5713_v32  ;;  %v4331_v58 = vsub.f32 %v4040_v14, %v129_v18  ;;  %v24_v32 = vld [vmem:[%s5689_s0 + $0x30] sm:$0xff] }
  0x1f   :  { %5894 = vst [vmem:[#allocation30_spill] sm:$0xff] %v4315_v62  ;;  %v412_v13 = vand.u32 4294901760, %v411_v56  ;;  %v5719_v17 = vand.u32 4294901760, %v4315_v62  ;;  %v5721_v49 = vand.u32 4294901760, %v4320_v38  ;;  %v83_v57 = vsel %vm66_vm0, %v23_v5, 0  ;;  %223 = vmatmul.mubr.f32.gmra.mrb[4].mxu0 %v222_v8  ;;  %1653 = vmatmul.mubr.f32.gmra.mrb[4].mxu1 %v1652_v3  ;;  %v40_v56 = vld [vmem:[%s5690_s1 + $0x30] sm:$0xff] }
  0x20   :  { %v1663_v26 = vand.u32 4294901760, %v1662_v31  ;;  %v244_v14 = vand.u32 4294901760, %v243_v12  ;;  %v5720_v18 = vand.u32 4294901760, %v4331_v58  ;;  %v4343_v25 = vand.u32 4294901760, %v83_v57  ;;  %228 = vmatprep.mubr.f32.mxu0 %v5722_v9  ;;  %1658 = vmatprep.mubr.f32.mxu1 %v5722_v9 }
  0x21   :  { %v3371_v5 = vpack.c.bf16 %v412_v13, %v400_v11  ;;  %v1673_v8 = vsub.f32 %v4315_v62, %v5719_v17  ;;  %v405_v31 = vsub.f32 %v4320_v38, %v5721_v49  ;;  %v1513_v3 = vsel %vm66_vm0, %v39_v52, 0  ;;  %v25_v13 = vld [vmem:[%s5689_s0 + $0x38] sm:$0xff]  ;;  %v26_v52 = vld [vmem:[%s5689_s0 + $0x40] sm:$0xff] }
  0x22   :  { %5895 = vst [vmem:[#allocation31_spill] sm:$0xff] %v4343_v25  ;;  %v417_v12 = vsub.f32 %v4331_v58, %v5720_v18  ;;  %v4361_v20 = vsub.f32 %v83_v57, %v4343_v25  ;;  %v4363_v35 = vand.u32 4294901760, %v1513_v3  ;;  %v86_v11 = vsel %vm66_vm0, %v24_v32, 0  ;;  %v41_v17 = vld [vmem:[%s5690_s1 + $0x38] sm:$0xff] }
  0x23   :  { %3372 = vmatprep.subr.bf16.mxu0 %v3371_v5  ;;  %v1674_v18 = vand.u32 4294901760, %v1673_v8  ;;  %3468 = vmatprep.subr.bf16.mxu1 %v3371_v5  ;;  %v406_v57 = vand.u32 4294901760, %v405_v31  ;;  %v4375_v49 = vand.u32 4294901760, %v86_v11  ;;  %v1516_v32 = vsel %vm66_vm0, %v40_v56, 0 }
  0x24   :  { %5896 = vst [vmem:[#allocation32_spill] sm:$0xff] %v4361_v20  ;;  %5897 = vst [vmem:[#allocation33_spill] sm:$0xff] %v4363_v35  ;;  %234 = vmatmul.mubr.f32.gmra.mrb[6].mxu0 %v233_v60  ;;  %1664 = vmatmul.mubr.f32.gmra.mrb[6].mxu1 %v1663_v26  ;;  %v418_v9 = vand.u32 4294901760, %v417_v12  ;;  %v5734_v62 = vand.u32 4294901760, %v4361_v20  ;;  %v4380_v47 = vsub.f32 %v1513_v3, %v4363_v35  ;;  %v4382_v10 = vand.u32 4294901760, %v1516_v32 }
  0x25   :  { %5898 = vst [vmem:[#allocation34_spill] sm:$0xff] %v4375_v49  ;;  %v5901_v0 = vmov 0.0   ;;  %v4387_v5 = vsub.f32 %v86_v11, %v4375_v49  ;;  %v89_v8 = vsel %vm66_vm0, %v25_v13, 0  ;;  %v1519_v60 = vsel %vm66_vm0, %v41_v17, 0  ;;  %v42_v11 = vld [vmem:[%s5690_s1 + $0x40] sm:$0xff] }
  0x26   :  { %5899 = vst [vmem:[#allocation35_spill] sm:$0xff] %v4380_v47  ;;  %5900 = vst [vmem:[#allocation36_spill] sm:$0xff] %v4382_v10  ;;  %239 = vmatprep.mubr.f32.mxu0 %v5901_v0  ;;  %1669 = vmatprep.mubr.f32.mxu1 %v5901_v0  ;;  %v92_v26 = vsel %vm66_vm0, %v26_v52, 0  ;;  %v3373_v56 = vpack.c.bf16 %v418_v9, %v406_v57  ;;  %v254_v31 = vsub.f32 %v4361_v20, %v5734_v62 }
  0x27   :  { %5902 = vst [vmem:[#allocation37_spill] sm:$0xff] %v4387_v5  ;;  %v5740_v3 = vand.u32 4294901760, %v4380_v47  ;;  %v4397_v12 = vsub.f32 %v1516_v32, %v4382_v10  ;;  %v5739_v13 = vand.u32 4294901760, %v4387_v5  ;;  %v4403_v42 = vand.u32 4294901760, %v89_v8 }
  0x28   :  { %v4405_v17 = vand.u32 4294901760, %v1519_v60  ;;  %v4407_v9 = vand.u32 4294901760, %v92_v26  ;;  %245 = vmatmul.mubr.f32.gmra.mrb[8].mxu0 %v244_v14  ;;  %1675 = vmatmul.mubr.f32.gmra.mrb[8].mxu1 %v1674_v18  ;;  %v255_v52 = vand.u32 4294901760, %v254_v31  ;;  %v5907_v62 = vand.u32 4294901760, %v4045_v15 }
  0x29   :  { %5903 = vst [vmem:[#allocation38_spill] sm:$0xff] %v4397_v12  ;;  %5904 = vst [vmem:[#allocation39_spill] sm:$0xff] %v4403_v42  ;;  %v1684_v57 = vsub.f32 %v4380_v47, %v5740_v3  ;;  %v5743_v32 = vand.u32 4294901760, %v4397_v12  ;;  %3374 = vmatpush1.bf16.msra.mxu0 %v3373_v56  ;;  %3470 = vmatpush1.bf16.msra.mxu1 %v3373_v56  ;;  %v265_v41 = vsub.f32 %v4387_v5, %v5739_v13 }
  0x2a   :  { %5905 = vst [vmem:[#allocation40_spill] sm:$0xff] %v4405_v17  ;;  %5906 = vst [vmem:[#allocation41_spill] sm:$0xff] %v4407_v9  ;;  %v4416_v20 = vsub.f32 %v4045_v15, %v5907_v62  ;;  %v4422_v14 = vsub.f32 %v89_v8, %v4403_v42  ;;  %v4425_v18 = vsub.f32 %v1519_v60, %v4405_v17  ;;  %v1522_v31 = vsel %vm66_vm0, %v42_v11, 0 }
  0x2b   :  { %250 = vmatprep.mubr.f32.mxu0 %v5901_v0  ;;  %1680 = vmatprep.mubr.f32.mxu1 %v5901_v0  ;;  %v1685_v15 = vand.u32 4294901760, %v1684_v57  ;;  %v1695_v62 = vsub.f32 %v4397_v12, %v5743_v32  ;;  %v4434_v56 = vsub.f32 %v92_v26, %v4407_v9  ;;  %v266_v13 = vand.u32 4294901760, %v265_v41 }
  0x2c   :  { %5908 = vst [vmem:[#allocation42_spill] sm:$0xff] %v4422_v14  ;;  %5909 = vst [vmem:[#allocation43_spill] sm:$0xff] %v4425_v18  ;;  %v5746_v8 = vand.u32 4294901760, %v4416_v20  ;;  %v5747_v60 = vand.u32 4294901760, %v4422_v14  ;;  %v5750_v3 = vand.u32 4294901760, %v4425_v18  ;;  %v5911_v11 = vand.u32 4294901760, %v4054_v19  ;;  %256 = vmatmul.mubr.f32.gmra.mrb[10].mxu0 %v255_v52 }
  0x2d   :  { %5910 = vst [vmem:[#allocation44_spill] sm:$0xff] %v4434_v56  ;;  %1686 = vmatmul.mubr.f32.gmra.mrb[10].mxu1 %v1685_v15  ;;  %v1696_v57 = vand.u32 4294901760, %v1695_v62  ;;  %v5757_v32 = vand.u32 4294901760, %v4434_v56  ;;  %v4448_v12 = vand.u32 4294901760, %v1522_v31  ;;  %261 = vmatprep.mubr.f32.mxu0 %v5901_v0  ;;  %v5913_v15 = vand.u32 4294901760, %v4060_v21 }
  0x2e   :  { %v4442_v5 = vsub.f32 %v4054_v19, %v5911_v11  ;;  %v423_v26 = vsub.f32 %v4416_v20, %v5746_v8  ;;  %1691 = vmatprep.mubr.f32.mxu1 %v5901_v0  ;;  %v276_v19 = vsub.f32 %v4422_v14, %v5747_v60  ;;  %v1706_v41 = vsub.f32 %v4425_v18, %v5750_v3  ;;  %v27_v11 = vld [vmem:[%s5689_s0 + $0x48] sm:$0xff] }
  0x2f   :  { %5912 = vst [vmem:[#allocation45_spill] sm:$0xff] %v4448_v12  ;;  %v4462_v62 = vsub.f32 %v4060_v21, %v5913_v15  ;;  %v287_v8 = vsub.f32 %v4434_v56, %v5757_v32  ;;  %v4471_v14 = vsub.f32 %v1522_v31, %v4448_v12  ;;  %v5915_v3 = vand.u32 4294901760, %v4065_v22  ;;  %v43_v21 = vld [vmem:[%s5690_s1 + $0x48] sm:$0xff]  ;;  %v28_v31 = vld [vmem:[%s5689_s0 + $0x50] sm:$0xff] }
  0x30   :  { %v424_v60 = vand.u32 4294901760, %v423_v26  ;;  %v277_v15 = vand.u32 4294901760, %v276_v19  ;;  %v1707_v18 = vand.u32 4294901760, %v1706_v41  ;;  %v5916_v47 = vand.u32 4294901760, %v4442_v5  ;;  %267 = vmatmul.mubr.f32.gmra.mrb[12].mxu0 %v266_v13 }
  0x31   :  { %5914 = vst [vmem:[#allocation46_spill] sm:$0xff] %v4471_v14  ;;  %v4476_v52 = vsub.f32 %v4065_v22, %v5915_v3  ;;  %v5760_v26 = vand.u32 4294901760, %v4462_v62  ;;  %1697 = vmatmul.mubr.f32.gmra.mrb[12].mxu1 %v1696_v57  ;;  %v288_v22 = vand.u32 4294901760, %v287_v8  ;;  %v5769_v3 = vand.u32 4294901760, %v4471_v14  ;;  %272 = vmatprep.mubr.f32.mxu0 %v5901_v0  ;;  %v44_v8 = vld [vmem:[%s5690_s1 + $0x50] sm:$0xff] }
  0x32   :  { %v435_v59 = vsub.f32 %v4442_v5, %v5916_v47  ;;  %v95_v19 = vsel %vm66_vm0, %v27_v11, 0  ;;  %1702 = vmatprep.mubr.f32.mxu1 %v5901_v0  ;;  %v1525_v13 = vsel %vm66_vm0, %v43_v21, 0  ;;  %v29_v21 = vld [vmem:[%s5689_s0 + $0x58] sm:$0xff]  ;;  %v1528_v40 = vsel %vm66_vm0, %v44_v8, 0 }
  0x33   :  { %v5770_v32 = vand.u32 4294901760, %v4476_v52  ;;  %v429_v41 = vsub.f32 %v4462_v62, %v5760_v26  ;;  %v4496_v56 = vand.u32 4294901760, %v95_v19  ;;  %v1717_v57 = vsub.f32 %v4471_v14, %v5769_v3  ;;  %v45_v3 = vld [vmem:[%s5690_s1 + $0x58] sm:$0xff] }
  0x34   :  { %v436_v47 = vand.u32 4294901760, %v435_v59  ;;  %v4508_v11 = vand.u32 4294901760, %v1525_v13  ;;  %v98_v26 = vsel %vm66_vm0, %v28_v31, 0  ;;  %278 = vmatmul.mubr.f32.gmra.mrb[14].mxu0 %v277_v15  ;;  %v30_v15 = vld [vmem:[%s5689_s0 + $0x60] sm:$0xff]  ;;  %v5939_v61 = vand.u32 4294901760, %v4106_v34 }
  0x35   :  { %5917 = vst [vmem:[#allocation47_spill] sm:$0xff] %v4496_v56  ;;  %v441_v59 = vsub.f32 %v4476_v52, %v5770_v32  ;;  %v430_v37 = vand.u32 4294901760, %v429_v41  ;;  %v4515_v30 = vsub.f32 %v95_v19, %v4496_v56  ;;  %v4517_v45 = vand.u32 4294901760, %v98_v26  ;;  %1708 = vmatmul.mubr.f32.gmra.mrb[14].mxu1 %v1707_v18  ;;  %283 = vmatprep.mubr.f32.mxu0 %v5901_v0 }
  0x36   :  { %5918 = vst [vmem:[#allocation48_spill] sm:$0xff] %v4508_v11  ;;  %v3375_v39 = vpack.c.bf16 %v436_v47, %v424_v60  ;;  %v1718_v32 = vand.u32 4294901760, %v1717_v57  ;;  %v4523_v31 = vsub.f32 %v1525_v13, %v4508_v11  ;;  %1713 = vmatprep.mubr.f32.mxu1 %v5901_v0  ;;  %v4532_v47 = vand.u32 4294901760, %v1528_v40 }
  0x37   :  { %5919 = vst [vmem:[#allocation49_spill] sm:$0xff] %v4515_v30  ;;  %5920 = vst [vmem:[#allocation50_spill] sm:$0xff] %v4517_v45  ;;  %v442_v14 = vand.u32 4294901760, %v441_v59  ;;  %v5777_v60 = vand.u32 4294901760, %v4515_v30  ;;  %v4530_v19 = vsub.f32 %v98_v26, %v4517_v45  ;;  %v101_v18 = vsel %vm66_vm0, %v29_v21, 0 }
  0x38   :  { %5921 = vst [vmem:[#allocation51_spill] sm:$0xff] %v4523_v31  ;;  %5923 = vst [vmem:[#allocation53_spill] sm:$0xff] %v4532_v47  ;;  %3376 = vmatprep.subr.bf16.mxu0 %v3375_v39  ;;  %3472 = vmatprep.subr.bf16.mxu1 %v3375_v39  ;;  %v5778_v13 = vand.u32 4294901760, %v4523_v31  ;;  %v4539_v8 = vand.u32 4294901760, %v101_v18  ;;  %v1531_v57 = vsel %vm66_vm0, %v45_v3, 0  ;;  %v4547_v21 = vsub.f32 %v1528_v40, %v4532_v47 }
  0x39   :  { %5922 = vst [vmem:[#allocation52_spill] sm:$0xff] %v4530_v19  ;;  %v3377_v41 = vpack.c.bf16 %v442_v14, %v430_v37  ;;  %v298_v26 = vsub.f32 %v4515_v30, %v5777_v60  ;;  %v5779_v59 = vand.u32 4294901760, %v4530_v19  ;;  %v4549_v24 = vand.u32 4294901760, %v1531_v57  ;;  %289 = vmatmul.mubr.f32.gmra.mrb[16].mxu0 %v288_v22  ;;  %1719 = vmatmul.mubr.f32.gmra.mrb[16].mxu1 %v1718_v32 }
  0x3a   :  { %5924 = vst [vmem:[#allocation54_spill] sm:$0xff] %v4539_v8  ;;  %5925 = vst [vmem:[#allocation55_spill] sm:$0xff] %v4547_v21  ;;  %v1728_v37 = vsub.f32 %v4523_v31, %v5778_v13  ;;  %v4555_v39 = vsub.f32 %v101_v18, %v4539_v8  ;;  %v104_v14 = vsel %vm66_vm0, %v30_v15, 0  ;;  %v5928_v3 = vand.u32 4294901760, %v4080_v27  ;;  %v46_v18 = vld [vmem:[%s5690_s1 + $0x60] sm:$0xff]  ;;  %294 = vmatprep.mubr.f32.mxu0 %v5901_v0 }
  0x3b   :  { %5926 = vst [vmem:[#allocation56_spill] sm:$0xff] %v4549_v24  ;;  %3378 = vmatpush1.bf16.msra.mxu0 %v3377_v41  ;;  %3474 = vmatpush1.bf16.msra.mxu1 %v3377_v41  ;;  %v299_v40 = vand.u32 4294901760, %v298_v26  ;;  %v309_v32 = vsub.f32 %v4530_v19, %v5779_v59  ;;  %v5784_v22 = vand.u32 4294901760, %v4547_v21  ;;  %v4568_v13 = vsub.f32 %v1531_v57, %v4549_v24 }
  0x3c   :  { %5927 = vst [vmem:[#allocation57_spill] sm:$0xff] %v4555_v39  ;;  %v4561_v60 = vsub.f32 %v4080_v27, %v5928_v3  ;;  %1724 = vmatprep.mubr.f32.mxu1 %v5901_v0  ;;  %v1729_v27 = vand.u32 4294901760, %v1728_v37  ;;  %v5785_v15 = vand.u32 4294901760, %v4555_v39  ;;  %v4576_v41 = vand.u32 4294901760, %v104_v14 }
  0x3d   :  { %5929 = vst [vmem:[#allocation58_spill] sm:$0xff] %v4568_v13  ;;  %v310_v3 = vand.u32 4294901760, %v309_v32  ;;  %v1739_v57 = vsub.f32 %v4547_v21, %v5784_v22  ;;  %v5931_v19 = vand.u32 4294901760, %v4085_v28  ;;  %300 = vmatmul.mubr.f32.gmra.mrb[18].mxu0 %v299_v40  ;;  %v1534_v59 = vsel %vm66_vm0, %v46_v18, 0  ;;  %v47_v18 = vld [vmem:[%s5690_s1 + $0x68] sm:$0xff] }
  0x3e   :  { %5930 = vst [vmem:[#allocation59_spill] sm:$0xff] %v4576_v41  ;;  %1730 = vmatmul.mubr.f32.gmra.mrb[18].mxu1 %v1729_v27  ;;  %v320_v37 = vsub.f32 %v4555_v39, %v5785_v15  ;;  %v4592_v26 = vsub.f32 %v104_v14, %v4576_v41  ;;  %v5933_v32 = vand.u32 4294901760, %v4561_v60  ;;  %305 = vmatprep.mubr.f32.mxu0 %v5901_v0  ;;  %v4604_v15 = vand.u32 4294901760, %v1534_v59  ;;  %v31_v14 = vld [vmem:[%s5689_s0 + $0x68] sm:$0xff] }
  0x3f   :  { %v4586_v31 = vsub.f32 %v4085_v28, %v5931_v19  ;;  %1735 = vmatprep.mubr.f32.mxu1 %v5901_v0  ;;  %v1740_v28 = vand.u32 4294901760, %v1739_v57  ;;  %v5934_v19 = vand.u32 4294901760, %v4568_v13  ;;  %v5936_v21 = vand.u32 4294901760, %v4090_v29 }
  0x40   :  { %5932 = vst [vmem:[#allocation60_spill] sm:$0xff] %v4592_v26  ;;  %v447_v22 = vsub.f32 %v4561_v60, %v5933_v32  ;;  %5935 = vst [vmem:[#allocation61_spill] sm:$0xff] %v4604_v15  ;;  %v321_v32 = vand.u32 4294901760, %v320_v37  ;;  %v5798_v39 = vand.u32 4294901760, %v4592_v26  ;;  %v4622_v23 = vsub.f32 %v1534_v59, %v4604_v15 }
  0x41   :  { %v1750_v40 = vsub.f32 %v4568_v13, %v5934_v19  ;;  %v4616_v19 = vsub.f32 %v4090_v29, %v5936_v21  ;;  %v5937_v13 = vand.u32 4294901760, %v4586_v31  ;;  %v4627_v37 = vsub.f32 %v4106_v34, %v5939_v61  ;;  %311 = vmatmul.mubr.f32.gmra.mrb[20].mxu0 %v310_v3 }
  0x42   :  { %v448_v57 = vand.u32 4294901760, %v447_v22  ;;  %5938 = vst [vmem:[#allocation62_spill] sm:$0xff] %v4622_v23  ;;  %v32_v22 = vld [vmem:[%s5689_s0 + $0x70] sm:$0xff]  ;;  %1741 = vmatmul.mubr.f32.gmra.mrb[20].mxu1 %v1740_v28  ;;  %v331_v29 = vsub.f32 %v4592_v26, %v5798_v39  ;;  %v107_v59 = vsel %vm66_vm0, %v31_v14, 0  ;;  %v1537_v21 = vsel %vm66_vm0, %v47_v18, 0  ;;  %316 = vmatprep.mubr.f32.mxu0 %v5901_v0 }
  0x43   :  { %v1751_v27 = vand.u32 4294901760, %v1750_v40  ;;  %v459_v30 = vsub.f32 %v4586_v31, %v5937_v13  ;;  %v5808_v13 = vand.u32 4294901760, %v4616_v19  ;;  %1746 = vmatprep.mubr.f32.mxu1 %v5901_v0  ;;  %v5807_v61 = vand.u32 4294901760, %v4622_v23  ;;  %v48_v40 = vld [vmem:[%s5690_s1 + $0x70] sm:$0xff] }
  0x44   :  { %v4642_v28 = vand.u32 4294901760, %v107_v59  ;;  %v332_v39 = vand.u32 4294901760, %v331_v29  ;;  %v4650_v18 = vand.u32 4294901760, %v1537_v21  ;;  %v110_v26 = vsel %vm66_vm0, %v32_v22, 0  ;;  %v33_v29 = vld [vmem:[%s5689_s0 + $0x78] sm:$0xff]  ;;  %s3979_s0 = smov [#allocation4]  }
  0x45   :  { %v460_v34 = vand.u32 4294901760, %v459_v30  ;;  %v453_v14 = vsub.f32 %v4616_v19, %v5808_v13  ;;  %v1761_v3 = vsub.f32 %v4622_v23, %v5807_v61  ;;  %v5942_v51 = vand.u32 4294901760, %v4627_v37  ;;  %v49_v22 = vld [vmem:[%s5690_s1 + $0x78] sm:$0xff]  ;;  %322 = vmatmul.mubr.f32.gmra.mrb[22].mxu0 %v321_v32  ;;  %s3339_s1 = sshll.u32 %s3979_s0, 4  ;;  %s3340_s1 = int_to_ptr.vmem [resolvable:$true] %s3339_s1 }
  0x46   :  { %5940 = vst [vmem:[#allocation63_spill] sm:$0xff] %v4642_v28  ;;  %5941 = vst [vmem:[#allocation64_spill] sm:$0xff] %v4650_v18  ;;  %v4660_v41 = vsub.f32 %v107_v59, %v4642_v28  ;;  %1752 = vmatmul.mubr.f32.gmra.mrb[22].mxu1 %v1751_v27  ;;  %v4671_v61 = vand.u32 4294901760, %v110_v26  ;;  %327 = vmatprep.mubr.f32.mxu0 %v5901_v0  ;;  %s3930_s6 = scalar_lea.vmem %s3340_s1, 16  ;;  %s3934_s7 = scalar_lea.vmem %s3340_s1, 32 }
  0x47   :  { %v3379_v30 = vpack.c.bf16 %v460_v34, %v448_v57  ;;  %v465_v15 = vsub.f32 %v4627_v37, %v5942_v51  ;;  %v454_v57 = vand.u32 4294901760, %v453_v14  ;;  %v4669_v34 = vsub.f32 %v1537_v21, %v4650_v18  ;;  %1757 = vmatprep.mubr.f32.mxu1 %v5901_v0  ;;  %p3931_p0 = scmp.ne.s32.totalorder %s3340_s1, %s3930_s6  ;;  %p3935_p1 = scmp.lt.s32.totalorder %s3340_s1, %s3340_s1 }
  0x48   :  { %5943 = vst [vmem:[#allocation65_spill] sm:$0xff] %v4671_v61  ;;  %v1540_v51 = vsel %vm66_vm0, %v48_v40, 0  ;;  %v1762_v59 = vand.u32 4294901760, %v1761_v3  ;;  %v5816_v23 = vand.u32 4294901760, %v4660_v41  ;;  %v4681_v32 = vsub.f32 %v110_v26, %v4671_v61  ;;  %p3936_p2 = scmp.lt.s32.totalorder %s3934_s7, %s3930_s6 }
  0x49   :  { %v466_v13 = vand.u32 4294901760, %v465_v15  ;;  %v4677_v28 = vand.u32 4294901760, %v1540_v51  ;;  %3380 = vmatprep.subr.bf16.mxu0 %v3379_v30  ;;  %3476 = vmatprep.subr.bf16.mxu1 %v3379_v30  ;;  %v5815_v27 = vand.u32 4294901760, %v4669_v34  ;;  %v113_v21 = vsel %vm66_vm0, %v33_v29, 0 }
  0x4a   :  { %v1543_v40 = vsel %vm66_vm0, %v49_v22, 0  ;;  %v342_v15 = vsub.f32 %v4660_v41, %v5816_v23  ;;  %v4691_v18 = vand.u32 4294901760, %v113_v21  ;;  %333 = vmatmul.mubr.f32.gmra.mrb[24].mxu0 %v332_v39  ;;  %1763 = vmatmul.mubr.f32.gmra.mrb[24].mxu1 %v1762_v59  ;;  %v5817_v30 = vand.u32 4294901760, %v4681_v32  ;;  %p3937_p3 = por %p3936_p2, %p3935_p1 }
  0x4b   :  { %5944 = vst [vmem:[#allocation66_spill] sm:$0xff] %v4677_v28  ;;  %v3381_v14 = vpack.c.bf16 %v466_v13, %v454_v57  ;;  %v4689_v3 = vsub.f32 %v1540_v51, %v4677_v28  ;;  %v1772_v26 = vsub.f32 %v4669_v34, %v5815_v27  ;;  %v4697_v29 = vand.u32 4294901760, %v1543_v40  ;;  %338 = vmatprep.mubr.f32.mxu0 %v5901_v0 }
  0x4c   :  { %5945 = vst [vmem:[#allocation67_spill] sm:$0xff] %v4691_v18  ;;  %v3383_v13 = vpack.c.bf16 %v4155_v48, %v4141_v44  ;;  %v343_v22 = vand.u32 4294901760, %v342_v15  ;;  %v4703_v51 = vsub.f32 %v113_v21, %v4691_v18  ;;  %v3385_v39 = vpack.c.bf16 %v4166_v54, %v4158_v50  ;;  %1768 = vmatprep.mubr.f32.mxu1 %v5901_v0  ;;  %p3938_p4 = pnand %p3937_p3, %p3931_p0 }
  0x4d   :  { %5946 = vst [vmem:[#allocation68_spill] sm:$0xff] %v4697_v29  ;;  %3382 = vmatpush1.bf16.msra.mxu0 %v3381_v14  ;;  %3478 = vmatpush1.bf16.msra.mxu1 %v3381_v14  ;;  %v5818_v57 = vand.u32 4294901760, %v4689_v3  ;;  %v1773_v59 = vand.u32 4294901760, %v1772_v26  ;;  %v353_v27 = vsub.f32 %v4681_v32, %v5817_v30  ;;  %v4713_v14 = vsub.f32 %v1543_v40, %v4697_v29 }
  0x4e   :  { %v5820_v15 = vand.u32 4294901760, %v4703_v51  ;;  %3384 = vmatprep.subr.bf16.mxu0 %v3383_v13  ;;  %3480 = vmatprep.subr.bf16.mxu1 %v3383_v13 }
  0x4f   :  { %v1783_v21 = vsub.f32 %v4689_v3, %v5818_v57  ;;  %344 = vmatmul.mubr.f32.gmra.mrb[26].mxu0 %v343_v22  ;;  %1774 = vmatmul.mubr.f32.gmra.mrb[26].mxu1 %v1773_v59  ;;  %v354_v23 = vand.u32 4294901760, %v353_v27  ;;  %v5819_v26 = vand.u32 4294901760, %v4713_v14  ;;  %v3387_v27 = vpack.c.bf16 %v4280_v6, %v4256_v63 }
  0x50   :  { %349 = vmatprep.mubr.f32.mxu0 %v5901_v0  ;;  %1779 = vmatprep.mubr.f32.mxu1 %v5901_v0  ;;  %v364_v40 = vsub.f32 %v4703_v51, %v5820_v15  ;;  %v3397_v59 = vpack.c.bf16 %v4627_v37, %v4616_v19  ;;  %v5958_v15 = vld [vmem:[#allocation11_spill] sm:$0xff] }
  0x51   :  { %v1784_v30 = vand.u32 4294901760, %v1783_v21  ;;  %v1794_v57 = vsub.f32 %v4713_v14, %v5819_v26  ;;  %v5947_v21 = vld [vmem:[#allocation59_spill] sm:$0xff]  ;;  %v5957_v26 = vld [vmem:[#allocation10_spill] sm:$0xff] }
  0x52   :  { %v365_v13 = vand.u32 4294901760, %v364_v40  ;;  %v5948_v40 = vld [vmem:[#allocation61_spill] sm:$0xff] }
  0x53   :  { %355 = vmatmul.mubr.f32.gmra.mrb[28].mxu0 %v354_v23  ;;  %1785 = vmatmul.mubr.f32.gmra.mrb[28].mxu1 %v1784_v30  ;;  %v1795_v22 = vand.u32 4294901760, %v1794_v57  ;;  %v3389_v23 = vpack.c.bf16 %v4331_v58, %v4320_v38  ;;  %v3391_v30 = vpack.c.bf16 %v4442_v5, %v4416_v20  ;;  %v3393_v57 = vpack.c.bf16 %v4476_v52, %v4462_v62 }
  0x54   :  { %360 = vmatprep.mubr.f32.mxu0 %v5901_v0  ;;  %1790 = vmatprep.mubr.f32.mxu1 %v5901_v0 }
  0x57   :  { %366 = vmatmul.mubr.f32.gmra.mrb[30].mxu0 %v365_v13  ;;  %1796 = vmatmul.mubr.f32.gmra.mrb[30].mxu1 %v1795_v22  ;;  %v5949_v13 = vld [vmem:[#allocation63_spill] sm:$0xff]  ;;  %v5950_v22 = vld [vmem:[#allocation64_spill] sm:$0xff] }
  0x58   :  { %516 = vmatprep.mubr.f32.mxu0 %v5901_v0  ;;  %1946 = vmatprep.mubr.f32.mxu1 %v5901_v0 }
  0x5b   :  { %518 = vmatmul.mubr.f32.vlgmr.msra.gmra.mrb[0].mxu0 %v4139_v43  ;;  %1948 = vmatmul.mubr.f32.vlgmr.msra.gmra.mrb[0].mxu1 %v4164_v53 }
  0x5c   :  { %3386 = vmatpush1.bf16.msra.mxu0 %v3385_v39  ;;  %3482 = vmatpush1.bf16.msra.mxu1 %v3385_v39  ;;  %v3395_v39 = vpack.c.bf16 %v4586_v31, %v4561_v60 }
  0x5d   :  { %523 = vmatprep.mubr.f32.mxu0 %v5901_v0  ;;  %1953 = vmatprep.mubr.f32.mxu1 %v5901_v0 }
  0x5e   :  { %3388 = vmatprep.subr.bf16.mxu0 %v3387_v27  ;;  %3484 = vmatprep.subr.bf16.mxu1 %v3387_v27  ;;  %v5951_v27 = vld [vmem:[#allocation15_spill] sm:$0xff] }
  0x5f   :  { %525 = vmatmul.mubr.f32.gmra.mrb[2].mxu0 %v4190_v1  ;;  %1955 = vmatmul.mubr.f32.gmra.mrb[2].mxu1 %v4192_v2 }
  0x60   :  { %530 = vmatprep.mubr.f32.mxu0 %v5901_v0  ;;  %1960 = vmatprep.mubr.f32.mxu1 %v5901_v0 }
  0x61   :  { %3390 = vmatpush1.bf16.msra.mxu0 %v3389_v23  ;;  %3486 = vmatpush1.bf16.msra.mxu1 %v3389_v23  ;;  %v5952_v23 = vld [vmem:[#allocation16_spill] sm:$0xff] }
  0x62   :  { %3392 = vmatprep.subr.bf16.mxu0 %v3391_v30  ;;  %3488 = vmatprep.subr.bf16.mxu1 %v3391_v30  ;;  %v5953_v30 = vld [vmem:[#allocation8_spill] sm:$0xff] }
  0x63   :  { %532 = vmatmul.mubr.f32.gmra.mrb[4].mxu0 %v4229_v55  ;;  %1962 = vmatmul.mubr.f32.gmra.mrb[4].mxu1 %v4247_v36  ;;  %v5990_v36 = vand.u32 4294901760, %v5951_v27  ;;  %v5991_v55 = vand.u32 4294901760, %v5952_v23 }
  0x64   :  { %537 = vmatprep.mubr.f32.mxu0 %v5901_v0  ;;  %1967 = vmatprep.mubr.f32.mxu1 %v5901_v0 }
  0x65   :  { %3394 = vmatpush1.bf16.msra.mxu0 %v3393_v57  ;;  %3490 = vmatpush1.bf16.msra.mxu1 %v3393_v57  ;;  %v5954_v57 = vld [vmem:[#allocation9_spill] sm:$0xff] }
  0x66   :  { %3396 = vmatprep.subr.bf16.mxu0 %v3395_v39  ;;  %3492 = vmatprep.subr.bf16.mxu1 %v3395_v39  ;;  %v5955_v39 = vld [vmem:[#allocation17_spill] sm:$0xff] }
  0x67   :  { %539 = vmatmul.mubr.f32.gmra.mrb[6].mxu0 %v4249_v46  ;;  %1969 = vmatmul.mubr.f32.gmra.mrb[6].mxu1 %v4268_v4  ;;  %v5988_v46 = vand.u32 4294901760, %v4256_v63 }
  0x68   :  { %544 = vmatprep.mubr.f32.mxu0 %v5901_v0  ;;  %1974 = vmatprep.mubr.f32.mxu1 %v5901_v0 }
  0x69   :  { %3398 = vmatpush1.bf16.msra.mxu0 %v3397_v59  ;;  %3494 = vmatpush1.bf16.msra.mxu1 %v3397_v59  ;;  %v5956_v59 = vld [vmem:[#allocation18_spill] sm:$0xff] }
  0x6a   :  { %3400 = vmatprep.subr.bf16.mxu0 %v4047_v16  ;;  %3496 = vmatprep.subr.bf16.mxu1 %v4047_v16 }
  0x6b   :  { %546 = vmatmul.mubr.f32.gmra.mrb[8].mxu0 %v4270_v7  ;;  %1976 = vmatmul.mubr.f32.gmra.mrb[8].mxu1 %v4299_v33  ;;  %v5985_v33 = vld [vmem:[#allocation62_spill] sm:$0xff]  ;;  %v5986_v7 = vand.u32 4294901760, %v4158_v50  ;;  %v5992_v50 = vand.u32 4294901760, %v4320_v38  ;;  %v6000_v38 = vand.u32 4294901760, %v4561_v60 }
  0x6c   :  { %551 = vmatprep.mubr.f32.mxu0 %v5901_v0  ;;  %1981 = vmatprep.mubr.f32.mxu1 %v5901_v0 }
  0x6f   :  { %553 = vmatmul.mubr.f32.gmra.mrb[10].mxu0 %v4343_v25  ;;  %1983 = vmatmul.mubr.f32.gmra.mrb[10].mxu1 %v4363_v35  ;;  %v5983_v35 = vld [vmem:[#allocation58_spill] sm:$0xff]  ;;  %v5984_v25 = vld [vmem:[#allocation60_spill] sm:$0xff] }
  0x70   :  { %558 = vmatprep.mubr.f32.mxu0 %v5901_v0  ;;  %1988 = vmatprep.mubr.f32.mxu1 %v5901_v0 }
  0x73   :  { %560 = vmatmul.mubr.f32.gmra.mrb[12].mxu0 %v4375_v49  ;;  %1990 = vmatmul.mubr.f32.gmra.mrb[12].mxu1 %v4382_v10  ;;  %v5981_v10 = vld [vmem:[#allocation55_spill] sm:$0xff]  ;;  %v5982_v49 = vld [vmem:[#allocation57_spill] sm:$0xff] }
  0x74   :  { %565 = vmatprep.mubr.f32.mxu0 %v5901_v0  ;;  %1995 = vmatprep.mubr.f32.mxu1 %v5901_v0 }
  0x77   :  { %567 = vmatmul.mubr.f32.gmra.mrb[14].mxu0 %v4403_v42  ;;  %1997 = vmatmul.mubr.f32.gmra.mrb[14].mxu1 %v4405_v17  ;;  %v5979_v17 = vld [vmem:[#allocation51_spill] sm:$0xff]  ;;  %v5980_v42 = vld [vmem:[#allocation52_spill] sm:$0xff] }
  0x78   :  { %572 = vmatprep.mubr.f32.mxu0 %v5901_v0  ;;  %2002 = vmatprep.mubr.f32.mxu1 %v5901_v0 }
  0x7b   :  { %574 = vmatmul.mubr.f32.gmra.mrb[16].mxu0 %v4407_v9  ;;  %2004 = vmatmul.mubr.f32.gmra.mrb[16].mxu1 %v4448_v12  ;;  %v5977_v12 = vld [vmem:[#allocation46_spill] sm:$0xff]  ;;  %v5978_v9 = vld [vmem:[#allocation49_spill] sm:$0xff] }
  0x7c   :  { %579 = vmatprep.mubr.f32.mxu0 %v5901_v0  ;;  %2009 = vmatprep.mubr.f32.mxu1 %v5901_v0 }
  0x7f   :  { %581 = vmatmul.mubr.f32.gmra.mrb[18].mxu0 %v4496_v56  ;;  %2011 = vmatmul.mubr.f32.gmra.mrb[18].mxu1 %v4508_v11  ;;  %v5975_v11 = vld [vmem:[#allocation43_spill] sm:$0xff]  ;;  %v5976_v56 = vld [vmem:[#allocation44_spill] sm:$0xff] }
  0x80   :  { %586 = vmatprep.mubr.f32.mxu0 %v5901_v0  ;;  %2016 = vmatprep.mubr.f32.mxu1 %v5901_v0 }
  0x83   :  { %588 = vmatmul.mubr.f32.gmra.mrb[20].mxu0 %v4517_v45  ;;  %2018 = vmatmul.mubr.f32.gmra.mrb[20].mxu1 %v4532_v47  ;;  %v5968_v47 = vld [vmem:[#allocation28_spill] sm:$0xff]  ;;  %v5973_v45 = vld [vmem:[#allocation38_spill] sm:$0xff] }
  0x84   :  { %593 = vmatprep.mubr.f32.mxu0 %v5901_v0  ;;  %2023 = vmatprep.mubr.f32.mxu1 %v5901_v0 }
  0x87   :  { %595 = vmatmul.mubr.f32.gmra.mrb[22].mxu0 %v4539_v8  ;;  %2025 = vmatmul.mubr.f32.gmra.mrb[22].mxu1 %v4549_v24  ;;  %v5966_v24 = vld [vmem:[#allocation27_spill] sm:$0xff]  ;;  %v5967_v8 = vld [vmem:[#allocation14_spill] sm:$0xff] }
  0x88   :  { %600 = vmatprep.mubr.f32.mxu0 %v5901_v0  ;;  %2030 = vmatprep.mubr.f32.mxu1 %v5901_v0 }
  0x8b   :  { %602 = vmatmul.mubr.f32.gmra.mrb[24].mxu0 %v5947_v21  ;;  %2032 = vmatmul.mubr.f32.gmra.mrb[24].mxu1 %v5948_v40  ;;  %v5965_v21 = vld [vmem:[#allocation24_spill] sm:$0xff] }
  0x8c   :  { %607 = vmatprep.mubr.f32.mxu0 %v5901_v0  ;;  %2037 = vmatprep.mubr.f32.mxu1 %v5901_v0 }
  0x8f   :  { %609 = vmatmul.mubr.f32.gmra.mrb[26].mxu0 %v5949_v13  ;;  %2039 = vmatmul.mubr.f32.gmra.mrb[26].mxu1 %v5950_v22  ;;  %v5963_v22 = vand.u32 4294901760, %v4141_v44  ;;  %v5964_v13 = vand.u32 4294901760, %v4155_v48  ;;  %v5969_v44 = vld [vmem:[#allocation30_spill] sm:$0xff]  ;;  %v5970_v48 = vld [vmem:[#allocation32_spill] sm:$0xff] }
  0x90   :  { %614 = vmatprep.mubr.f32.mxu0 %v5901_v0  ;;  %2044 = vmatprep.mubr.f32.mxu1 %v5901_v0 }
  0x91   :  { %v3415_v40 = vpack.c.bf16 %v5964_v13, %v5963_v22  ;;  %v5971_v13 = vld [vmem:[#allocation35_spill] sm:$0xff]  ;;  %v5972_v22 = vld [vmem:[#allocation37_spill] sm:$0xff] }
  0x93   :  { %616 = vmatmul.mubr.f32.gmra.mrb[28].mxu0 %v4671_v61  ;;  %2046 = vmatmul.mubr.f32.gmra.mrb[28].mxu1 %v4677_v28  ;;  %v5961_v28 = vld [vmem:[#allocation12_spill] sm:$0xff]  ;;  %v5962_v61 = vld [vmem:[#allocation13_spill] sm:$0xff] }
  0x94   :  { %621 = vmatprep.mubr.f32.mxu0 %v5901_v0  ;;  %2051 = vmatprep.mubr.f32.mxu1 %v5901_v0 }
  0x97   :  { %623 = vmatmul.mubr.f32.gmra.mrb[30].mxu0 %v4691_v18  ;;  %2053 = vmatmul.mubr.f32.gmra.mrb[30].mxu1 %v4697_v29  ;;  %v5959_v29 = vld [vmem:[#allocation20_spill] sm:$0xff]  ;;  %v5960_v18 = vld [vmem:[#allocation23_spill] sm:$0xff] }
  0x98   :  { %725 = vmatprep.mubr.f32.mxu0 %v5901_v0  ;;  %2155 = vmatprep.mubr.f32.mxu1 %v5901_v0 }
  0x9b   :  { %728 = vmatmul.mubr.f32.vlgmr.msra.gmra.mrb[0].mxu0 %v5951_v27  ;;  %2158 = vmatmul.mubr.f32.vlgmr.msra.gmra.mrb[0].mxu1 %v5952_v23  ;;  %v6015_v27 = vand.u32 4294901760, %v5975_v11  ;;  %v6016_v23 = vand.u32 4294901760, %v5976_v56 }
  0x9c   :  { %3402 = vmatpush1.bf16.msra.mxu0 %v5953_v30  ;;  %3498 = vmatpush1.bf16.msra.mxu1 %v5953_v30 }
  0x9d   :  { %733 = vmatprep.mubr.f32.mxu0 %v5901_v0  ;;  %2163 = vmatprep.mubr.f32.mxu1 %v5901_v0 }
  0x9e   :  { %3404 = vmatprep.subr.bf16.mxu0 %v5954_v57  ;;  %3500 = vmatprep.subr.bf16.mxu1 %v5954_v57 }
  0x9f   :  { %736 = vmatmul.mubr.f32.gmra.mrb[2].mxu0 %v5955_v39  ;;  %2166 = vmatmul.mubr.f32.gmra.mrb[2].mxu1 %v5956_v59 }
  0xa0   :  { %741 = vmatprep.mubr.f32.mxu0 %v5901_v0  ;;  %2171 = vmatprep.mubr.f32.mxu1 %v5901_v0 }
  0xa1   :  { %3406 = vmatpush1.bf16.msra.mxu0 %v5957_v26  ;;  %3502 = vmatpush1.bf16.msra.mxu1 %v5957_v26 }
  0xa2   :  { %3408 = vmatprep.subr.bf16.mxu0 %v5958_v15  ;;  %3504 = vmatprep.subr.bf16.mxu1 %v5958_v15 }
  0xa3   :  { %744 = vmatmul.mubr.f32.gmra.mrb[4].mxu0 %v5959_v29  ;;  %2174 = vmatmul.mubr.f32.gmra.mrb[4].mxu1 %v5960_v18 }
  0xa4   :  { %749 = vmatprep.mubr.f32.mxu0 %v5901_v0  ;;  %2179 = vmatprep.mubr.f32.mxu1 %v5901_v0 }
  0xa5   :  { %3410 = vmatpush1.bf16.msra.mxu0 %v5961_v28  ;;  %3506 = vmatpush1.bf16.msra.mxu1 %v5961_v28 }
  0xa6   :  { %3412 = vmatprep.subr.bf16.mxu0 %v5962_v61  ;;  %3508 = vmatprep.subr.bf16.mxu1 %v5962_v61  ;;  %v5989_v61 = vand.u32 4294901760, %v4280_v6  ;;  %v5998_v6 = vand.u32 4294901760, %v4462_v62  ;;  %v6005_v62 = vand.u32 4294901760, %v4627_v37  ;;  %v6009_v37 = vand.u32 4294901760, %v5969_v44 }
  0xa7   :  { %752 = vmatmul.mubr.f32.gmra.mrb[6].mxu0 %v5965_v21  ;;  %2182 = vmatmul.mubr.f32.gmra.mrb[6].mxu1 %v5966_v24 }
  0xa8   :  { %757 = vmatprep.mubr.f32.mxu0 %v5901_v0  ;;  %2187 = vmatprep.mubr.f32.mxu1 %v5901_v0  ;;  %v3419_v28 = vpack.c.bf16 %v5989_v61, %v5988_v46  ;;  %v5994_v46 = vand.u32 4294901760, %v4416_v20  ;;  %v6002_v61 = vand.u32 4294901760, %v5959_v29  ;;  %v6007_v29 = vand.u32 4294901760, %v5966_v24 }
  0xa9   :  { %3414 = vmatpush1.bf16.msra.mxu0 %v5967_v8  ;;  %3510 = vmatpush1.bf16.msra.mxu1 %v5967_v8  ;;  %v5987_v8 = vand.u32 4294901760, %v4166_v54  ;;  %v5993_v54 = vand.u32 4294901760, %v4331_v58  ;;  %v5999_v58 = vand.u32 4294901760, %v4476_v52  ;;  %v6004_v52 = vand.u32 4294901760, %v4616_v19 }
  0xaa   :  { %3416 = vmatprep.subr.bf16.mxu0 %v3415_v40  ;;  %3512 = vmatprep.subr.bf16.mxu1 %v3415_v40  ;;  %v5974_v40 = vld [vmem:[#allocation42_spill] sm:$0xff]  ;;  %v6008_v19 = vand.u32 4294901760, %v5968_v47  ;;  %v6010_v24 = vand.u32 4294901760, %v5970_v48 }
  0xab   :  { %760 = vmatmul.mubr.f32.gmra.mrb[8].mxu0 %v5968_v47  ;;  %2190 = vmatmul.mubr.f32.gmra.mrb[8].mxu1 %v5969_v44  ;;  %v3417_v4 = vpack.c.bf16 %v5987_v8, %v5986_v7  ;;  %v3421_v63 = vpack.c.bf16 %v5993_v54, %v5992_v50  ;;  %v3425_v20 = vpack.c.bf16 %v5999_v58, %v5998_v6  ;;  %v6013_v47 = vand.u32 4294901760, %v5973_v45  ;;  %v6041_v44 = vld [vmem:[#allocation31_spill] sm:$0xff]  ;;  %v6046_v50 = vld [vmem:[#allocation40_spill] sm:$0xff]  ;;  %v6047_v54 = vld [vmem:[#allocation41_spill] sm:$0xff] }
  0xac   :  { %765 = vmatprep.mubr.f32.mxu0 %v5901_v0  ;;  %2195 = vmatprep.mubr.f32.mxu1 %v5901_v0  ;;  %v3429_v60 = vpack.c.bf16 %v6005_v62, %v6004_v52  ;;  %v6054_v6 = vld [vmem:[#allocation56_spill] sm:$0xff]  ;;  %v6055_v58 = vld [vmem:[#allocation59_spill] sm:$0xff] }
  0xad   :  { %v6062_v52 = vld [vmem:[#allocation68_spill] sm:$0xff] }
  0xaf   :  { %768 = vmatmul.mubr.f32.gmra.mrb[10].mxu0 %v5970_v48  ;;  %2198 = vmatmul.mubr.f32.gmra.mrb[10].mxu1 %v5971_v13  ;;  %v6042_v48 = vld [vmem:[#allocation33_spill] sm:$0xff] }
  0xb0   :  { %773 = vmatprep.mubr.f32.mxu0 %v5901_v0  ;;  %2203 = vmatprep.mubr.f32.mxu1 %v5901_v0 }
  0xb3   :  { %776 = vmatmul.mubr.f32.gmra.mrb[12].mxu0 %v5972_v22  ;;  %2206 = vmatmul.mubr.f32.gmra.mrb[12].mxu1 %v5973_v45  ;;  %v6017_v45 = vand.u32 4294901760, %v5977_v12 }
  0xb4   :  { %781 = vmatprep.mubr.f32.mxu0 %v5901_v0  ;;  %2211 = vmatprep.mubr.f32.mxu1 %v5901_v0 }
  0xb7   :  { %784 = vmatmul.mubr.f32.gmra.mrb[14].mxu0 %v5974_v40  ;;  %2214 = vmatmul.mubr.f32.gmra.mrb[14].mxu1 %v5975_v11  ;;  %v6019_v11 = vand.u32 4294901760, %v5979_v17 }
  0xb8   :  { %789 = vmatprep.mubr.f32.mxu0 %v5901_v0  ;;  %2219 = vmatprep.mubr.f32.mxu1 %v5901_v0 }
  0xbb   :  { %792 = vmatmul.mubr.f32.gmra.mrb[16].mxu0 %v5976_v56  ;;  %2222 = vmatmul.mubr.f32.gmra.mrb[16].mxu1 %v5977_v12  ;;  %v6020_v56 = vand.u32 4294901760, %v5980_v42  ;;  %v6021_v12 = vand.u32 4294901760, %v5981_v10 }
  0xbc   :  { %797 = vmatprep.mubr.f32.mxu0 %v5901_v0  ;;  %2227 = vmatprep.mubr.f32.mxu1 %v5901_v0 }
  0xbf   :  { %800 = vmatmul.mubr.f32.gmra.mrb[18].mxu0 %v5978_v9  ;;  %2230 = vmatmul.mubr.f32.gmra.mrb[18].mxu1 %v5979_v17  ;;  %v6023_v17 = vand.u32 4294901760, %v5983_v35 }
  0xc0   :  { %805 = vmatprep.mubr.f32.mxu0 %v5901_v0  ;;  %2235 = vmatprep.mubr.f32.mxu1 %v5901_v0 }
  0xc3   :  { %808 = vmatmul.mubr.f32.gmra.mrb[20].mxu0 %v5980_v42  ;;  %2238 = vmatmul.mubr.f32.gmra.mrb[20].mxu1 %v5981_v10  ;;  %v6024_v42 = vand.u32 4294901760, %v5984_v25  ;;  %v6025_v10 = vand.u32 4294901760, %v5985_v33 }
  0xc4   :  { %813 = vmatprep.mubr.f32.mxu0 %v5901_v0  ;;  %2243 = vmatprep.mubr.f32.mxu1 %v5901_v0 }
  0xc7   :  { %816 = vmatmul.mubr.f32.gmra.mrb[22].mxu0 %v5982_v49  ;;  %2246 = vmatmul.mubr.f32.gmra.mrb[22].mxu1 %v5983_v35  ;;  %v6027_v35 = vand.u32 4294901760, %v4669_v34 }
  0xc8   :  { %821 = vmatprep.mubr.f32.mxu0 %v5901_v0  ;;  %2251 = vmatprep.mubr.f32.mxu1 %v5901_v0 }
  0xcb   :  { %824 = vmatmul.mubr.f32.gmra.mrb[24].mxu0 %v5984_v25  ;;  %2254 = vmatmul.mubr.f32.gmra.mrb[24].mxu1 %v5985_v33  ;;  %v6028_v25 = vand.u32 4294901760, %v4681_v32  ;;  %v6029_v33 = vand.u32 4294901760, %v4689_v3 }
  0xcc   :  { %829 = vmatprep.mubr.f32.mxu0 %v5901_v0  ;;  %2259 = vmatprep.mubr.f32.mxu1 %v5901_v0 }
  0xcf   :  { %832 = vmatmul.mubr.f32.gmra.mrb[26].mxu0 %v4660_v41  ;;  %2262 = vmatmul.mubr.f32.gmra.mrb[26].mxu1 %v4669_v34  ;;  %v6031_v34 = vand.u32 4294901760, %v4713_v14 }
  0xd0   :  { %837 = vmatprep.mubr.f32.mxu0 %v5901_v0  ;;  %2267 = vmatprep.mubr.f32.mxu1 %v5901_v0 }
  0xd3   :  { %840 = vmatmul.mubr.f32.gmra.mrb[28].mxu0 %v4681_v32  ;;  %2270 = vmatmul.mubr.f32.gmra.mrb[28].mxu1 %v4689_v3  ;;  %v6032_v32 = vld [vmem:[#allocation19_spill] sm:$0xff]  ;;  %v6033_v3 = vld [vmem:[#allocation21_spill] sm:$0xff] }
  0xd4   :  { %845 = vmatprep.mubr.f32.mxu0 %v5901_v0  ;;  %2275 = vmatprep.mubr.f32.mxu1 %v5901_v0 }
  0xd7   :  { %848 = vmatmul.mubr.f32.gmra.mrb[30].mxu0 %v4703_v51  ;;  %2278 = vmatmul.mubr.f32.gmra.mrb[30].mxu1 %v4713_v14  ;;  %v6035_v14 = vld [vmem:[#allocation13_spill] sm:$0xff] }
  0xd8   :  { %934 = vmatprep.mubr.f32.mxu0 %v5901_v0  ;;  %2364 = vmatprep.mubr.f32.mxu1 %v5901_v0 }
  0xdb   :  { %938 = vmatmul.mubr.f32.vlgmr.msra.gmra.mrb[0].mxu0 %v5990_v36  ;;  %2368 = vmatmul.mubr.f32.vlgmr.msra.gmra.mrb[0].mxu1 %v5991_v55  ;;  %v5995_v36 = vand.u32 4294901760, %v4442_v5  ;;  %v5996_v55 = vand.u32 4294901760, %v5955_v39  ;;  %v6001_v5 = vand.u32 4294901760, %v4586_v31  ;;  %v6006_v31 = vand.u32 4294901760, %v5965_v21 }
  0xdc   :  { %3418 = vmatpush1.bf16.msra.mxu0 %v3417_v4  ;;  %3514 = vmatpush1.bf16.msra.mxu1 %v3417_v4  ;;  %v5997_v4 = vand.u32 4294901760, %v5956_v59  ;;  %v6014_v21 = vand.u32 4294901760, %v5974_v40  ;;  %v6018_v39 = vand.u32 4294901760, %v5978_v9  ;;  %v6022_v9 = vand.u32 4294901760, %v5982_v49  ;;  %v6040_v59 = vld [vmem:[#allocation29_spill] sm:$0xff]  ;;  %v6045_v40 = vld [vmem:[#allocation39_spill] sm:$0xff] }
  0xdd   :  { %943 = vmatprep.mubr.f32.mxu0 %v5901_v0  ;;  %2373 = vmatprep.mubr.f32.mxu1 %v5901_v0  ;;  %v3423_v7 = vpack.c.bf16 %v5995_v36, %v5994_v46  ;;  %v3427_v8 = vpack.c.bf16 %v6001_v5, %v6000_v38  ;;  %v6026_v49 = vand.u32 4294901760, %v4660_v41  ;;  %v6030_v41 = vand.u32 4294901760, %v4703_v51  ;;  %v6034_v51 = vld [vmem:[#allocation12_spill] sm:$0xff]  ;;  %v6049_v46 = vld [vmem:[#allocation47_spill] sm:$0xff] }
  0xde   :  { %3420 = vmatprep.subr.bf16.mxu0 %v3419_v28  ;;  %3516 = vmatprep.subr.bf16.mxu1 %v3419_v28  ;;  %v6003_v28 = vand.u32 4294901760, %v5960_v18  ;;  %v6011_v18 = vand.u32 4294901760, %v5971_v13  ;;  %v6043_v13 = vld [vmem:[#allocation34_spill] sm:$0xff]  ;;  %v6050_v36 = vld [vmem:[#allocation48_spill] sm:$0xff]  ;;  %v6057_v38 = vld [vmem:[#allocation63_spill] sm:$0xff] }
  0xdf   :  { %947 = vmatmul.mubr.f32.gmra.mrb[2].mxu0 %v5996_v55  ;;  %2377 = vmatmul.mubr.f32.gmra.mrb[2].mxu1 %v5997_v4  ;;  %v6052_v55 = vld [vmem:[#allocation53_spill] sm:$0xff]  ;;  %v6053_v4 = vld [vmem:[#allocation54_spill] sm:$0xff]  ;;  %v6058_v5 = vld [vmem:[#allocation64_spill] sm:$0xff] }
  0xe0   :  { %952 = vmatprep.mubr.f32.mxu0 %v5901_v0  ;;  %2382 = vmatprep.mubr.f32.mxu1 %v5901_v0 }
  0xe1   :  { %3422 = vmatpush1.bf16.msra.mxu0 %v3421_v63  ;;  %3518 = vmatpush1.bf16.msra.mxu1 %v3421_v63  ;;  %v6048_v63 = vld [vmem:[#allocation45_spill] sm:$0xff] }
  0xe2   :  { %3424 = vmatprep.subr.bf16.mxu0 %v3423_v7  ;;  %3520 = vmatprep.subr.bf16.mxu1 %v3423_v7  ;;  %v6051_v7 = vld [vmem:[#allocation50_spill] sm:$0xff] }
  0xe3   :  { %956 = vmatmul.mubr.f32.gmra.mrb[4].mxu0 %v6002_v61  ;;  %2386 = vmatmul.mubr.f32.gmra.mrb[4].mxu1 %v6003_v28  ;;  %v6060_v61 = vld [vmem:[#allocation66_spill] sm:$0xff]  ;;  %v6061_v28 = vld [vmem:[#allocation67_spill] sm:$0xff] }
  0xe4   :  { %961 = vmatprep.mubr.f32.mxu0 %v5901_v0  ;;  %2391 = vmatprep.mubr.f32.mxu1 %v5901_v0 }
  0xe5   :  { %3426 = vmatpush1.bf16.msra.mxu0 %v3425_v20  ;;  %3522 = vmatpush1.bf16.msra.mxu1 %v3425_v20  ;;  %v6056_v20 = vld [vmem:[#allocation61_spill] sm:$0xff] }
  0xe6   :  { %3428 = vmatprep.subr.bf16.mxu0 %v3427_v8  ;;  %3524 = vmatprep.subr.bf16.mxu1 %v3427_v8  ;;  %v6059_v8 = vld [vmem:[#allocation65_spill] sm:$0xff] }
  0xe7   :  { %965 = vmatmul.mubr.f32.gmra.mrb[6].mxu0 %v6006_v31  ;;  %2395 = vmatmul.mubr.f32.gmra.mrb[6].mxu1 %v6007_v29 }
  0xe8   :  { %970 = vmatprep.mubr.f32.mxu0 %v5901_v0  ;;  %2400 = vmatprep.mubr.f32.mxu1 %v5901_v0 }
  0xe9   :  { %3430 = vmatpush1.bf16.msra.mxu0 %v3429_v60  ;;  %3526 = vmatpush1.bf16.msra.mxu1 %v3429_v60 }
  0xea   :  { %3432 = vmatprep.subr.bf16.mxu0 %v4047_v16  ;;  %3528 = vmatprep.subr.bf16.mxu1 %v4047_v16  ;;  %v6012_v16 = vand.u32 4294901760, %v5972_v22  ;;  %v6044_v22 = vld [vmem:[#allocation36_spill] sm:$0xff] }
  0xeb   :  { %974 = vmatmul.mubr.f32.gmra.mrb[8].mxu0 %v6008_v19  ;;  %2404 = vmatmul.mubr.f32.gmra.mrb[8].mxu1 %v6009_v37 }
  0xec   :  { %979 = vmatprep.mubr.f32.mxu0 %v5901_v0  ;;  %2409 = vmatprep.mubr.f32.mxu1 %v5901_v0 }
  0xef   :  { %983 = vmatmul.mubr.f32.gmra.mrb[10].mxu0 %v6010_v24  ;;  %2413 = vmatmul.mubr.f32.gmra.mrb[10].mxu1 %v6011_v18 }
  0xf0   :  { %988 = vmatprep.mubr.f32.mxu0 %v5901_v0  ;;  %2418 = vmatprep.mubr.f32.mxu1 %v5901_v0 }
  0xf3   :  { %992 = vmatmul.mubr.f32.gmra.mrb[12].mxu0 %v6012_v16  ;;  %2422 = vmatmul.mubr.f32.gmra.mrb[12].mxu1 %v6013_v47 }
  0xf4   :  { %997 = vmatprep.mubr.f32.mxu0 %v5901_v0  ;;  %2427 = vmatprep.mubr.f32.mxu1 %v5901_v0 }
  0xf7   :  { %1001 = vmatmul.mubr.f32.gmra.mrb[14].mxu0 %v6014_v21  ;;  %2431 = vmatmul.mubr.f32.gmra.mrb[14].mxu1 %v6015_v27 }
  0xf8   :  { %1006 = vmatprep.mubr.f32.mxu0 %v5901_v0  ;;  %2436 = vmatprep.mubr.f32.mxu1 %v5901_v0 }
  0xfb   :  { %1010 = vmatmul.mubr.f32.gmra.mrb[16].mxu0 %v6016_v23  ;;  %2440 = vmatmul.mubr.f32.gmra.mrb[16].mxu1 %v6017_v45 }
  0xfc   :  { %1015 = vmatprep.mubr.f32.mxu0 %v5901_v0  ;;  %2445 = vmatprep.mubr.f32.mxu1 %v5901_v0 }
  0xff   :  { %1019 = vmatmul.mubr.f32.gmra.mrb[18].mxu0 %v6018_v39  ;;  %2449 = vmatmul.mubr.f32.gmra.mrb[18].mxu1 %v6019_v11 }
 0x100   :  { %1024 = vmatprep.mubr.f32.mxu0 %v5901_v0  ;;  %2454 = vmatprep.mubr.f32.mxu1 %v5901_v0 }
 0x103   :  { %1028 = vmatmul.mubr.f32.gmra.mrb[20].mxu0 %v6020_v56  ;;  %2458 = vmatmul.mubr.f32.gmra.mrb[20].mxu1 %v6021_v12 }
 0x104   :  { %1033 = vmatprep.mubr.f32.mxu0 %v5901_v0  ;;  %2463 = vmatprep.mubr.f32.mxu1 %v5901_v0 }
 0x107   :  { %1037 = vmatmul.mubr.f32.gmra.mrb[22].mxu0 %v6022_v9  ;;  %2467 = vmatmul.mubr.f32.gmra.mrb[22].mxu1 %v6023_v17 }
 0x108   :  { %1042 = vmatprep.mubr.f32.mxu0 %v5901_v0  ;;  %2472 = vmatprep.mubr.f32.mxu1 %v5901_v0 }
 0x10b   :  { %1046 = vmatmul.mubr.f32.gmra.mrb[24].mxu0 %v6024_v42  ;;  %2476 = vmatmul.mubr.f32.gmra.mrb[24].mxu1 %v6025_v10 }
 0x10c   :  { %1051 = vmatprep.mubr.f32.mxu0 %v5901_v0  ;;  %2481 = vmatprep.mubr.f32.mxu1 %v5901_v0 }
 0x10f   :  { %1055 = vmatmul.mubr.f32.gmra.mrb[26].mxu0 %v6026_v49  ;;  %2485 = vmatmul.mubr.f32.gmra.mrb[26].mxu1 %v6027_v35 }
 0x110   :  { %1060 = vmatprep.mubr.f32.mxu0 %v5901_v0  ;;  %2490 = vmatprep.mubr.f32.mxu1 %v5901_v0 }
 0x113   :  { %1064 = vmatmul.mubr.f32.gmra.mrb[28].mxu0 %v6028_v25  ;;  %2494 = vmatmul.mubr.f32.gmra.mrb[28].mxu1 %v6029_v33 }
 0x114   :  { %1069 = vmatprep.mubr.f32.mxu0 %v5901_v0  ;;  %2499 = vmatprep.mubr.f32.mxu1 %v5901_v0 }
 0x117   :  { %1073 = vmatmul.mubr.f32.gmra.mrb[30].mxu0 %v6030_v41  ;;  %2503 = vmatmul.mubr.f32.gmra.mrb[30].mxu1 %v6031_v34 }
 0x118   :  { %1191 = vmatprep.mubr.f32.mxu0 %v5901_v0  ;;  %2621 = vmatprep.mubr.f32.mxu1 %v5901_v0 }
 0x11b   :  { %1193 = vmatmul.mubr.f32.vlgmr.msra.gmra.mrb[0].mxu0 %v4139_v43  ;;  %2623 = vmatmul.mubr.f32.vlgmr.msra.gmra.mrb[0].mxu1 %v4164_v53 }
 0x11c   :  { %3434 = vmatpush1.bf16.msra.mxu0 %v5953_v30  ;;  %3530 = vmatpush1.bf16.msra.mxu1 %v5953_v30  ;;  %v6037_v30 = vld [vmem:[#allocation25_spill] sm:$0xff] }
 0x11d   :  { %1198 = vmatprep.mubr.f32.mxu0 %v5901_v0  ;;  %2628 = vmatprep.mubr.f32.mxu1 %v5901_v0 }
 0x11e   :  { %3436 = vmatprep.subr.bf16.mxu0 %v5954_v57  ;;  %3532 = vmatprep.subr.bf16.mxu1 %v5954_v57  ;;  %v6039_v57 = vld [vmem:[#allocation26_spill] sm:$0xff] }
 0x11f   :  { %1200 = vmatmul.mubr.f32.gmra.mrb[2].mxu0 %v4190_v1  ;;  %2630 = vmatmul.mubr.f32.gmra.mrb[2].mxu1 %v4192_v2 }
 0x120   :  { %1205 = vmatprep.mubr.f32.mxu0 %v5901_v0  ;;  %2635 = vmatprep.mubr.f32.mxu1 %v5901_v0 }
 0x121   :  { %3438 = vmatpush1.bf16.msra.mxu0 %v5957_v26  ;;  %3534 = vmatpush1.bf16.msra.mxu1 %v5957_v26  ;;  %v6036_v26 = vld [vmem:[#allocation22_spill] sm:$0xff] }
 0x122   :  { %3440 = vmatprep.subr.bf16.mxu0 %v5958_v15  ;;  %3536 = vmatprep.subr.bf16.mxu1 %v5958_v15  ;;  %v6038_v15 = vld [vmem:[#allocation14_spill] sm:$0xff] }
 0x123   :  { %1207 = vmatmul.mubr.f32.gmra.mrb[4].mxu0 %v6032_v32  ;;  %2637 = vmatmul.mubr.f32.gmra.mrb[4].mxu1 %v6033_v3 }
 0x124   :  { %1212 = vmatprep.mubr.f32.mxu0 %v5901_v0  ;;  %2642 = vmatprep.mubr.f32.mxu1 %v5901_v0 }
 0x125   :  { %3442 = vmatpush1.bf16.msra.mxu0 %v6034_v51  ;;  %3538 = vmatpush1.bf16.msra.mxu1 %v6034_v51 }
 0x126   :  { %3444 = vmatprep.subr.bf16.mxu0 %v6035_v14  ;;  %3540 = vmatprep.subr.bf16.mxu1 %v6035_v14 }
 0x127   :  { %1214 = vmatmul.mubr.f32.gmra.mrb[6].mxu0 %v6036_v26  ;;  %2644 = vmatmul.mubr.f32.gmra.mrb[6].mxu1 %v6037_v30 }
 0x128   :  { %1219 = vmatprep.mubr.f32.mxu0 %v5901_v0  ;;  %2649 = vmatprep.mubr.f32.mxu1 %v5901_v0 }
 0x129   :  { %3446 = vmatpush1.bf16.msra.mxu0 %v6038_v15  ;;  %3542 = vmatpush1.bf16.msra.mxu1 %v6038_v15 }
 0x12b   :  { %1221 = vmatmul.mubr.f32.gmra.mrb[8].mxu0 %v6039_v57  ;;  %2651 = vmatmul.mubr.f32.gmra.mrb[8].mxu1 %v6040_v59 }
 0x12c   :  { %1226 = vmatprep.mubr.f32.mxu0 %v5901_v0  ;;  %2656 = vmatprep.mubr.f32.mxu1 %v5901_v0 }
 0x12f   :  { %1228 = vmatmul.mubr.f32.gmra.mrb[10].mxu0 %v6041_v44  ;;  %2658 = vmatmul.mubr.f32.gmra.mrb[10].mxu1 %v6042_v48 }
 0x130   :  { %1233 = vmatprep.mubr.f32.mxu0 %v5901_v0  ;;  %2663 = vmatprep.mubr.f32.mxu1 %v5901_v0 }
 0x133   :  { %1235 = vmatmul.mubr.f32.gmra.mrb[12].mxu0 %v6043_v13  ;;  %2665 = vmatmul.mubr.f32.gmra.mrb[12].mxu1 %v6044_v22 }
 0x134   :  { %1240 = vmatprep.mubr.f32.mxu0 %v5901_v0  ;;  %2670 = vmatprep.mubr.f32.mxu1 %v5901_v0 }
 0x137   :  { %1242 = vmatmul.mubr.f32.gmra.mrb[14].mxu0 %v6045_v40  ;;  %2672 = vmatmul.mubr.f32.gmra.mrb[14].mxu1 %v6046_v50 }
 0x138   :  { %1247 = vmatprep.mubr.f32.mxu0 %v5901_v0  ;;  %2677 = vmatprep.mubr.f32.mxu1 %v5901_v0 }
 0x13b   :  { %1249 = vmatmul.mubr.f32.gmra.mrb[16].mxu0 %v6047_v54  ;;  %2679 = vmatmul.mubr.f32.gmra.mrb[16].mxu1 %v6048_v63 }
 0x13c   :  { %1254 = vmatprep.mubr.f32.mxu0 %v5901_v0  ;;  %2684 = vmatprep.mubr.f32.mxu1 %v5901_v0 }
 0x13f   :  { %1256 = vmatmul.mubr.f32.gmra.mrb[18].mxu0 %v6049_v46  ;;  %2686 = vmatmul.mubr.f32.gmra.mrb[18].mxu1 %v6050_v36 }
 0x140   :  { %1261 = vmatprep.mubr.f32.mxu0 %v5901_v0  ;;  %2691 = vmatprep.mubr.f32.mxu1 %v5901_v0 }
 0x143   :  { %1263 = vmatmul.mubr.f32.gmra.mrb[20].mxu0 %v6051_v7  ;;  %2693 = vmatmul.mubr.f32.gmra.mrb[20].mxu1 %v6052_v55 }
 0x144   :  { %1268 = vmatprep.mubr.f32.mxu0 %v5901_v0  ;;  %2698 = vmatprep.mubr.f32.mxu1 %v5901_v0 }
 0x147   :  { %1270 = vmatmul.mubr.f32.gmra.mrb[22].mxu0 %v6053_v4  ;;  %2700 = vmatmul.mubr.f32.gmra.mrb[22].mxu1 %v6054_v6 }
 0x148   :  { %1275 = vmatprep.mubr.f32.mxu0 %v5901_v0  ;;  %2705 = vmatprep.mubr.f32.mxu1 %v5901_v0 }
 0x14b   :  { %1277 = vmatmul.mubr.f32.gmra.mrb[24].mxu0 %v6055_v58  ;;  %2707 = vmatmul.mubr.f32.gmra.mrb[24].mxu1 %v6056_v20 }
 0x14c   :  { %1282 = vmatprep.mubr.f32.mxu0 %v5901_v0  ;;  %2712 = vmatprep.mubr.f32.mxu1 %v5901_v0 }
 0x14f   :  { %1284 = vmatmul.mubr.f32.gmra.mrb[26].mxu0 %v6057_v38  ;;  %2714 = vmatmul.mubr.f32.gmra.mrb[26].mxu1 %v6058_v5 }
 0x150   :  { %1289 = vmatprep.mubr.f32.mxu0 %v5901_v0  ;;  %2719 = vmatprep.mubr.f32.mxu1 %v5901_v0 }
 0x153   :  { %1291 = vmatmul.mubr.f32.gmra.mrb[28].mxu0 %v6059_v8  ;;  %2721 = vmatmul.mubr.f32.gmra.mrb[28].mxu1 %v6060_v61 }
 0x154   :  { %1296 = vmatprep.mubr.f32.mxu0 %v5901_v0  ;;  %2726 = vmatprep.mubr.f32.mxu1 %v5901_v0 }
 0x157   :  { %1298 = vmatmul.mubr.f32.gmra.mrb[30].mxu0 %v6061_v28  ;;  %2728 = vmatmul.mubr.f32.gmra.mrb[30].mxu1 %v6062_v52 }
 0x158   :  { %1384 = vmatprep.mubr.f32.mxu0 %v5901_v0  ;;  %2814 = vmatprep.mubr.f32.mxu1 %v5901_v0 }
 0x15b   :  { %1386 = vmatmul.mubr.f32.vlgmr.msra.gmra.mrb[0].mxu0 %v4139_v43  ;;  %2816 = vmatmul.mubr.f32.vlgmr.msra.gmra.mrb[0].mxu1 %v4164_v53 }
 0x15c   :  { %1391 = vmatprep.mubr.f32.mxu0 %v5901_v0  ;;  %2821 = vmatprep.mubr.f32.mxu1 %v5901_v0 }
 0x15f   :  { %1393 = vmatmul.mubr.f32.gmra.mrb[2].mxu0 %v4190_v1  ;;  %2823 = vmatmul.mubr.f32.gmra.mrb[2].mxu1 %v4192_v2 }
 0x160   :  { %1398 = vmatprep.mubr.f32.mxu0 %v5901_v0  ;;  %2828 = vmatprep.mubr.f32.mxu1 %v5901_v0 }
 0x163   :  { %1400 = vmatmul.mubr.f32.gmra.mrb[4].mxu0 %v6032_v32  ;;  %2830 = vmatmul.mubr.f32.gmra.mrb[4].mxu1 %v6033_v3 }
 0x164   :  { %1405 = vmatprep.mubr.f32.mxu0 %v5901_v0  ;;  %2835 = vmatprep.mubr.f32.mxu1 %v5901_v0 }
 0x167   :  { %1407 = vmatmul.mubr.f32.gmra.mrb[6].mxu0 %v6036_v26  ;;  %2837 = vmatmul.mubr.f32.gmra.mrb[6].mxu1 %v6037_v30 }
 0x168   :  { %1412 = vmatprep.mubr.f32.mxu0 %v5901_v0  ;;  %2842 = vmatprep.mubr.f32.mxu1 %v5901_v0 }
 0x16b   :  { %1414 = vmatmul.mubr.f32.gmra.mrb[8].mxu0 %v6039_v57  ;;  %2844 = vmatmul.mubr.f32.gmra.mrb[8].mxu1 %v6040_v59 }
 0x16c   :  { %1419 = vmatprep.mubr.f32.mxu0 %v5901_v0  ;;  %2849 = vmatprep.mubr.f32.mxu1 %v5901_v0 }
 0x16f   :  { %1421 = vmatmul.mubr.f32.gmra.mrb[10].mxu0 %v6041_v44  ;;  %2851 = vmatmul.mubr.f32.gmra.mrb[10].mxu1 %v6042_v48 }
 0x170   :  { %1426 = vmatprep.mubr.f32.mxu0 %v5901_v0  ;;  %2856 = vmatprep.mubr.f32.mxu1 %v5901_v0 }
 0x173   :  { %1428 = vmatmul.mubr.f32.gmra.mrb[12].mxu0 %v6043_v13  ;;  %2858 = vmatmul.mubr.f32.gmra.mrb[12].mxu1 %v6044_v22 }
 0x174   :  { %1433 = vmatprep.mubr.f32.mxu0 %v5901_v0  ;;  %2863 = vmatprep.mubr.f32.mxu1 %v5901_v0 }
 0x177   :  { %1435 = vmatmul.mubr.f32.gmra.mrb[14].mxu0 %v6045_v40  ;;  %2865 = vmatmul.mubr.f32.gmra.mrb[14].mxu1 %v6046_v50 }
 0x178   :  { %1440 = vmatprep.mubr.f32.mxu0 %v5901_v0  ;;  %2870 = vmatprep.mubr.f32.mxu1 %v5901_v0 }
 0x17b   :  { %1442 = vmatmul.mubr.f32.gmra.mrb[16].mxu0 %v6047_v54  ;;  %2872 = vmatmul.mubr.f32.gmra.mrb[16].mxu1 %v6048_v63 }
 0x17c   :  { %1447 = vmatprep.mubr.f32.mxu0 %v5901_v0  ;;  %2877 = vmatprep.mubr.f32.mxu1 %v5901_v0 }
 0x17f   :  { %1449 = vmatmul.mubr.f32.gmra.mrb[18].mxu0 %v6049_v46  ;;  %2879 = vmatmul.mubr.f32.gmra.mrb[18].mxu1 %v6050_v36 }
 0x180   :  { %1454 = vmatprep.mubr.f32.mxu0 %v5901_v0  ;;  %2884 = vmatprep.mubr.f32.mxu1 %v5901_v0 }
 0x183   :  { %1456 = vmatmul.mubr.f32.gmra.mrb[20].mxu0 %v6051_v7  ;;  %2886 = vmatmul.mubr.f32.gmra.mrb[20].mxu1 %v6052_v55 }
 0x184   :  { %1461 = vmatprep.mubr.f32.mxu0 %v5901_v0  ;;  %2891 = vmatprep.mubr.f32.mxu1 %v5901_v0 }
 0x187   :  { %1463 = vmatmul.mubr.f32.gmra.mrb[22].mxu0 %v6053_v4  ;;  %2893 = vmatmul.mubr.f32.gmra.mrb[22].mxu1 %v6054_v6 }
 0x188   :  { %1468 = vmatprep.mubr.f32.mxu0 %v5901_v0  ;;  %2898 = vmatprep.mubr.f32.mxu1 %v5901_v0 }
 0x18b   :  { %1470 = vmatmul.mubr.f32.gmra.mrb[24].mxu0 %v6055_v58  ;;  %2900 = vmatmul.mubr.f32.gmra.mrb[24].mxu1 %v6056_v20 }
 0x18c   :  { %1475 = vmatprep.mubr.f32.mxu0 %v5901_v0  ;;  %2905 = vmatprep.mubr.f32.mxu1 %v5901_v0 }
 0x18f   :  { %1477 = vmatmul.mubr.f32.gmra.mrb[26].mxu0 %v6057_v38  ;;  %2907 = vmatmul.mubr.f32.gmra.mrb[26].mxu1 %v6058_v5 }
 0x190   :  { %1482 = vmatprep.mubr.f32.mxu0 %v5901_v0  ;;  %2912 = vmatprep.mubr.f32.mxu1 %v5901_v0 }
 0x193   :  { %1484 = vmatmul.mubr.f32.gmra.mrb[28].mxu0 %v6059_v8  ;;  %2914 = vmatmul.mubr.f32.gmra.mrb[28].mxu1 %v6060_v61 }
 0x194   :  { %1489 = vmatprep.mubr.f32.mxu0 %v5901_v0  ;;  %2919 = vmatprep.mubr.f32.mxu1 %v5901_v0 }
 0x197   :  { %1491 = vmatmul.mubr.f32.gmra.mrb[30].mxu0 %v6061_v28  ;;  %2921 = vmatmul.mubr.f32.gmra.mrb[30].mxu1 %v6062_v52 }
 0x22e   :  { %v1387_v43 = vpop.f32.mrb[0].mxu0  ;;  %v2817_v53 = vpop.f32.mrb[0].mxu1 }
 0x22f   :  { %v2927_v1 = vmul.f32 %v1387_v43, %v1387_v43  ;;  %v3087_v2 = vmul.f32 %v2817_v53, %v2817_v53  ;;  %v1389_v62 = vpop.f32.mrb[1].mxu0  ;;  %v2819_v60 = vpop.f32.mrb[1].mxu1 }
 0x230   :  { %v2943_v31 = vmul.f32 %v1389_v62, %v1389_v62  ;;  %v3103_v29 = vmul.f32 %v2819_v60, %v2819_v60 }
 0x232   :  { %v2959_v19 = vadd.f32 %v2943_v31, %v2927_v1  ;;  %v5158_v37 = vadd.f32 %v3103_v29, %v3087_v2  ;;  %v1394_v24 = vpop.f32.mrb[2].mxu0  ;;  %v2824_v18 = vpop.f32.mrb[2].mxu1 }
 0x233   :  { %v1396_v16 = vpop.f32.mrb[3].mxu0  ;;  %v2826_v47 = vpop.f32.mrb[3].mxu1  ;;  %v2928_v0 = vmul.f32 %v1394_v24, %v1394_v24  ;;  %v3088_v21 = vmul.f32 %v2824_v18, %v2824_v18 }
 0x234   :  { %3866 = vrsqrt.f32 %v2959_v19  ;;  %v2944_v27 = vmul.f32 %v1396_v16, %v1396_v16  ;;  %v3104_v23 = vmul.f32 %v2826_v47, %v2826_v47  ;;  %vm2977_vm1 = vcmp.eq.f32.partialorder %v2959_v19, inf }
 0x235   :  { %3868 = vrsqrt.f32 %v5158_v37  ;;  %vm2979_vm2 = vcmp.eq.f32.partialorder %v2959_v19, 0.0  ;;  %v2980_v15 = vand.u32 2147483648, %v2959_v19  ;;  %vm3137_vm3 = vcmp.eq.f32.partialorder %v5158_v37, inf }
 0x236   :  { %v1401_v45 = vpop.f32.mrb[4].mxu0  ;;  %v2831_v39 = vpop.f32.mrb[4].mxu1  ;;  %v5161_v17 = vadd.f32 %v2944_v27, %v2928_v0  ;;  %v5163_v42 = vadd.f32 %v3104_v23, %v3088_v21  ;;  %vm3139_vm4 = vcmp.eq.f32.partialorder %v5158_v37, 0.0  ;;  %v3140_v13 = vand.u32 2147483648, %v5158_v37 }
 0x237   :  { %v2929_v11 = vmul.f32 %v1401_v45, %v1401_v45  ;;  %v3089_v56 = vmul.f32 %v2831_v39, %v2831_v39  ;;  %v1403_v12 = vpop.f32.mrb[5].mxu0  ;;  %v2833_v9 = vpop.f32.mrb[5].mxu1 }
 0x238   :  { %v2945_v10 = vmul.f32 %v1403_v12, %v1403_v12  ;;  %v3105_v49 = vmul.f32 %v2833_v9, %v2833_v9  ;;  %3870 = vrsqrt.f32 %v5161_v17  ;;  %vm2984_vm5 = vcmp.eq.f32.partialorder %v5161_v17, inf }
 0x239   :  { %3872 = vrsqrt.f32 %v5163_v42  ;;  %vm2986_vm6 = vcmp.eq.f32.partialorder %v5161_v17, 0.0  ;;  %v2987_v36 = vand.u32 2147483648, %v5161_v17  ;;  %vm3144_vm7 = vcmp.eq.f32.partialorder %v5163_v42, inf }
 0x23a   :  { %v1408_v35 = vpop.f32.mrb[6].mxu0  ;;  %v2838_v25 = vpop.f32.mrb[6].mxu1  ;;  %v5167_v34 = vadd.f32 %v2945_v10, %v2929_v11  ;;  %v5169_v32 = vadd.f32 %v3105_v49, %v3089_v56  ;;  %vm3146_vm8 = vcmp.eq.f32.partialorder %v5163_v42, 0.0  ;;  %v3147_v5 = vand.u32 2147483648, %v5163_v42 }
 0x23b   :  { %v1410_v33 = vpop.f32.mrb[7].mxu0  ;;  %v2840_v41 = vpop.f32.mrb[7].mxu1  ;;  %v2930_v3 = vmul.f32 %v1408_v35, %v1408_v35  ;;  %v3090_v51 = vmul.f32 %v2838_v25, %v2838_v25 }
 0x23c   :  { %v2946_v14 = vmul.f32 %v1410_v33, %v1410_v33  ;;  %v3106_v26 = vmul.f32 %v2840_v41, %v2840_v41  ;;  %3874 = vrsqrt.f32 %v5167_v34  ;;  %vm2991_vm9 = vcmp.eq.f32.partialorder %v5167_v34, inf }
 0x23d   :  { %3876 = vrsqrt.f32 %v5169_v32  ;;  %vm2993_vm10 = vcmp.eq.f32.partialorder %v5167_v34, 0.0  ;;  %v2994_v29 = vand.u32 2147483648, %v5167_v34  ;;  %vm3151_vm11 = vcmp.eq.f32.partialorder %v5169_v32, inf }
 0x23e   :  { %v3867_v30 = vpop.eup %3866  ;;  %v1415_v57 = vpop.f32.mrb[8].mxu0  ;;  %v5179_v54 = vadd.f32 %v2946_v14, %v2930_v3  ;;  %v5181_v63 = vadd.f32 %v3106_v26, %v3090_v51  ;;  %vm3153_vm12 = vcmp.eq.f32.partialorder %v5169_v32, 0.0  ;;  %v3154_v16 = vand.u32 2147483648, %v5169_v32 }
 0x23f   :  { %v2845_v59 = vpop.f32.mrb[8].mxu1  ;;  %v3869_v44 = vpop.eup %3868  ;;  %v2976_v48 = vmul.f32 %v3867_v30, %v2959_v19  ;;  %v2931_v7 = vmul.f32 %v1415_v57, %v1415_v57 }
 0x240   :  { %v1417_v22 = vpop.f32.mrb[9].mxu0  ;;  %v2847_v40 = vpop.f32.mrb[9].mxu1  ;;  %v3136_v50 = vmul.f32 %v3869_v44, %v5158_v37  ;;  %3878 = vrsqrt.f32 %v5179_v54  ;;  %v3091_v43 = vmul.f32 %v2845_v59, %v2845_v59  ;;  %vm2998_vm13 = vcmp.eq.f32.partialorder %v5179_v54, inf }
 0x241   :  { %v2978_v46 = vsel %vm2977_vm1, %v2959_v19, %v2976_v48  ;;  %v2947_v55 = vmul.f32 %v1417_v22, %v1417_v22  ;;  %3880 = vrsqrt.f32 %v5181_v63  ;;  %v3107_v62 = vmul.f32 %v2847_v40, %v2847_v40 }
 0x242   :  { %v2981_v4 = vsel %vm2979_vm2, %v2980_v15, %v2978_v46  ;;  %v3138_v6 = vsel %vm3137_vm3, %v5158_v37, %v3136_v50  ;;  %v1422_v58 = vpop.f32.mrb[10].mxu0  ;;  %v2852_v20 = vpop.f32.mrb[10].mxu1  ;;  %vm3000_vm14 = vcmp.eq.f32.partialorder %v5179_v54, 0.0  ;;  %v3001_v48 = vand.u32 2147483648, %v5179_v54 }
 0x243   :  { %v3141_v38 = vsel %vm3139_vm4, %v3140_v13, %v3138_v6  ;;  %v1424_v8 = vpop.f32.mrb[11].mxu0  ;;  %v2854_v61 = vpop.f32.mrb[11].mxu1  ;;  %v5199_v2 = vadd.f32 %v2947_v55, %v2931_v7  ;;  %v2932_v60 = vmul.f32 %v1422_v58, %v1422_v58  ;;  %v5216_v45 = vadd.f32 %v3107_v62, %v3091_v43 }
 0x244   :  { %v3871_v28 = vpop.eup %3870  ;;  %v3247_v52 = vsub.f32 %v2981_v4, %v3141_v38  ;;  %v2948_v19 = vmul.f32 %v1424_v8, %v1424_v8  ;;  %v3092_v33 = vmul.f32 %v2852_v20, %v2852_v20  ;;  %v3108_v41 = vmul.f32 %v2854_v61, %v2854_v61 }
 0x245   :  { %v3873_v53 = vpop.eup %3872  ;;  %v2983_v1 = vmul.f32 %v3871_v28, %v5161_v17  ;;  %3882 = vrsqrt.f32 %v5199_v2  ;;  %vm3158_vm15 = vcmp.eq.f32.partialorder %v5181_v63, inf  ;;  %vm3160_vm0 = vcmp.eq.f32.partialorder %v5181_v63, 0.0 }
 0x246   :  { %v3143_v31 = vmul.f32 %v3873_v53, %v5163_v42  ;;  %v1429_v37 = vpop.f32.mrb[12].mxu0  ;;  %v2859_v24 = vpop.f32.mrb[12].mxu1  ;;  %v5222_v12 = vadd.f32 %v2948_v19, %v2932_v60  ;;  %3884 = vrsqrt.f32 %v5216_v45  ;;  %v3263_v25 = vmul.f32 %v3247_v52, %v3247_v52 }
 0x247   :  { %v2985_v18 = vsel %vm2984_vm5, %v5161_v17, %v2983_v1  ;;  %v1431_v47 = vpop.f32.mrb[13].mxu0  ;;  %v2861_v0 = vpop.f32.mrb[13].mxu1  ;;  %v5254_v7 = vadd.f32 %v3108_v41, %v3092_v33  ;;  %vm3005_vm1 = vcmp.eq.f32.partialorder %v5199_v2, inf  ;;  %v2933_v8 = vmul.f32 %v1429_v37, %v1429_v37 }
 0x248   :  { %v3875_v21 = vpop.eup %3874  ;;  %v2988_v27 = vsel %vm2986_vm6, %v2987_v36, %v2985_v18  ;;  %v3145_v23 = vsel %vm3144_vm7, %v5163_v42, %v3143_v31  ;;  %3886 = vrsqrt.f32 %v5222_v12  ;;  %v3161_v36 = vand.u32 2147483648, %v5181_v63 }
 0x249   :  { %v3877_v39 = vpop.eup %3876  ;;  %v3148_v11 = vsel %vm3146_vm8, %v3147_v5, %v3145_v23  ;;  %v2990_v56 = vmul.f32 %v3875_v21, %v5167_v34  ;;  %3888 = vrsqrt.f32 %v5254_v7  ;;  %v3093_v61 = vmul.f32 %v2859_v24, %v2859_v24 }
 0x24a   :  { %v3248_v9 = vsub.f32 %v2988_v27, %v3148_v11  ;;  %v3300_v17 = vadd.f32 %v3148_v11, %v3141_v38  ;;  %v3150_v10 = vmul.f32 %v3877_v39, %v5169_v32  ;;  %v1436_v49 = vpop.f32.mrb[14].mxu0  ;;  %v5226_v35 = vpop.f32.mrb[14].mxu1  ;;  %vm3007_vm2 = vcmp.eq.f32.partialorder %v5199_v2, 0.0 }
 0x24b   :  { %v2992_v42 = vsel %vm2991_vm9, %v5167_v34, %v2990_v56  ;;  %v1438_v3 = vpop.f32.mrb[15].mxu0  ;;  %v5231_v51 = vpop.f32.mrb[15].mxu1  ;;  %v2934_v60 = vmul.f32 %v1436_v49, %v1436_v49  ;;  %v3008_v18 = vand.u32 2147483648, %v5199_v2  ;;  %vm3165_vm3 = vcmp.eq.f32.partialorder %v5216_v45, inf }
 0x24c   :  { %v3879_v14 = vpop.eup %3878  ;;  %v3264_v26 = vmul.f32 %v3248_v9, %v3248_v9  ;;  %v2995_v30 = vsel %vm2993_vm10, %v2994_v29, %v2992_v42  ;;  %v3152_v15 = vsel %vm3151_vm11, %v5169_v32, %v3150_v10  ;;  %v3168_v11 = vand.u32 2147483648, %v5216_v45 }
 0x24d   :  { %v3881_v57 = vpop.eup %3880  ;;  %v3155_v59 = vsel %vm3153_vm12, %v3154_v16, %v3152_v15  ;;  %v2997_v44 = vmul.f32 %v3879_v14, %v5179_v54  ;;  %v2950_v16 = vmul.f32 %v1438_v3, %v1438_v3  ;;  %vm3167_vm4 = vcmp.eq.f32.partialorder %v5216_v45, 0.0 }
 0x24e   :  { %v3279_v13 = vadd.f32 %v3264_v26, %v3263_v25  ;;  %v3249_v22 = vsub.f32 %v2995_v30, %v3155_v59  ;;  %v3301_v34 = vadd.f32 %v3300_v17, %v3155_v59  ;;  %v3157_v40 = vmul.f32 %v3881_v57, %v5181_v63  ;;  %v5245_v50 = vpop.f32.mrb[16].mxu0  ;;  %v5247_v46 = vpop.f32.mrb[16].mxu1 }
 0x24f   :  { %v2999_v32 = vsel %vm2998_vm13, %v5179_v54, %v2997_v44  ;;  %v5256_v55 = vpop.f32.mrb[17].mxu0  ;;  %v5258_v4 = vpop.f32.mrb[17].mxu1  ;;  %v2949_v54 = vmul.f32 %v1431_v47, %v1431_v47  ;;  %v5286_v56 = vadd.f32 %v2950_v16, %v2934_v60  ;;  %v3094_v33 = vmul.f32 %v5226_v35, %v5226_v35 }
 0x250   :  { %v3265_v6 = vmul.f32 %v3249_v22, %v3249_v22  ;;  %v3002_v58 = vsel %vm3000_vm14, %v3001_v48, %v2999_v32  ;;  %v3159_v20 = vsel %vm3158_vm15, %v5181_v63, %v3157_v40  ;;  %v3883_v38 = vpop.eup %3882  ;;  %v3109_v63 = vmul.f32 %v2861_v0, %v2861_v0 }
 0x251   :  { %v3162_v5 = vsel %vm3160_vm0, %v3161_v36, %v3159_v20  ;;  %v3004_v53 = vmul.f32 %v3883_v38, %v5199_v2  ;;  %v3885_v19 = vpop.eup %3884  ;;  %v5279_v47 = vadd.f32 %v2949_v54, %v2933_v8  ;;  %v3110_v41 = vmul.f32 %v5231_v51, %v5231_v51 }
 0x252   :  { %v3280_v28 = vadd.f32 %v3279_v13, %v3265_v6  ;;  %v3250_v52 = vsub.f32 %v3002_v58, %v3162_v5  ;;  %v3302_v43 = vadd.f32 %v3301_v34, %v3162_v5  ;;  %v1450_v1 = vpop.f32.mrb[18].mxu0  ;;  %v5266_v62 = vpop.f32.mrb[18].mxu1  ;;  %v3164_v21 = vmul.f32 %v3885_v19, %v5216_v45 }
 0x253   :  { %v5269_v31 = vpop.f32.mrb[19].mxu0  ;;  %v5271_v29 = vpop.f32.mrb[19].mxu1  ;;  %v3006_v24 = vsel %vm3005_vm1, %v5199_v2, %v3004_v53  ;;  %v5281_v0 = vadd.f32 %v3109_v63, %v3093_v61  ;;  %3890 = vrsqrt.f32 %v5279_v47  ;;  %vm3012_vm5 = vcmp.eq.f32.partialorder %v5222_v12, inf }
 0x254   :  { %v3266_v37 = vmul.f32 %v3250_v52, %v3250_v52  ;;  %v3887_v27 = vpop.eup %3886  ;;  %v3009_v39 = vsel %vm3007_vm2, %v3008_v18, %v3006_v24  ;;  %v3166_v10 = vsel %vm3165_vm3, %v5216_v45, %v3164_v21  ;;  %vm3014_vm6 = vcmp.eq.f32.partialorder %v5222_v12, 0.0 }
 0x255   :  { %v3011_v49 = vmul.f32 %v3887_v27, %v5222_v12  ;;  %v3169_v42 = vsel %vm3167_vm4, %v3168_v11, %v3166_v10  ;;  %3892 = vrsqrt.f32 %v5281_v0  ;;  %v3889_v15 = vpop.eup %3888  ;;  %v3015_v35 = vand.u32 2147483648, %v5222_v12 }
 0x256   :  { %v3281_v23 = vadd.f32 %v3280_v28, %v3266_v37  ;;  %v5288_v9 = vpop.f32.mrb[20].mxu0  ;;  %v5290_v17 = vpop.f32.mrb[20].mxu1  ;;  %v3251_v3 = vsub.f32 %v3009_v39, %v3169_v42  ;;  %v3303_v14 = vadd.f32 %v3302_v43, %v3169_v42  ;;  %3894 = vrsqrt.f32 %v5286_v56 }
 0x257   :  { %v5296_v25 = vpop.f32.mrb[21].mxu0  ;;  %v5298_v2 = vpop.f32.mrb[21].mxu1  ;;  %v3013_v45 = vsel %vm3012_vm5, %v5222_v12, %v3011_v49  ;;  %vm3172_vm7 = vcmp.eq.f32.partialorder %v5254_v7, inf  ;;  %v2935_v51 = vmul.f32 %v5245_v50, %v5245_v50  ;;  %v3171_v48 = vmul.f32 %v3889_v15, %v5254_v7 }
 0x258   :  { %v3267_v57 = vmul.f32 %v3251_v3, %v3251_v3  ;;  %v5322_v13 = vadd.f32 %v3110_v41, %v3094_v33  ;;  %v3095_v22 = vmul.f32 %v5247_v46, %v5247_v46  ;;  %v2951_v34 = vmul.f32 %v5256_v55, %v5256_v55 }
 0x259   :  { %v3016_v32 = vsel %vm3014_vm6, %v3015_v35, %v3013_v45  ;;  %v3175_v50 = vand.u32 2147483648, %v5254_v7  ;;  %v3111_v36 = vmul.f32 %v5258_v4, %v5258_v4  ;;  %v3173_v6 = vsel %vm3172_vm7, %v5254_v7, %v3171_v48 }
 0x25a   :  { %v5309_v26 = vpop.f32.mrb[22].mxu0  ;;  %v5311_v30 = vpop.f32.mrb[22].mxu1  ;;  %v3282_v40 = vadd.f32 %v3281_v23, %v3267_v57  ;;  %vm3174_vm8 = vcmp.eq.f32.partialorder %v5254_v7, 0.0  ;;  %3896 = vrsqrt.f32 %v5322_v13  ;;  %v2936_v58 = vmul.f32 %v1450_v1, %v1450_v1 }
 0x25b   :  { %v5317_v59 = vpop.f32.mrb[23].mxu0  ;;  %v5319_v44 = vpop.f32.mrb[23].mxu1  ;;  %v3176_v55 = vsel %vm3174_vm8, %v3175_v50, %v3173_v6  ;;  %v5340_v38 = vadd.f32 %v2951_v34, %v2935_v51  ;;  %v5342_v12 = vadd.f32 %v3111_v36, %v3095_v22  ;;  %v3096_v5 = vmul.f32 %v5266_v62, %v5266_v62 }
 0x25c   :  { %v3252_v7 = vsub.f32 %v3016_v32, %v3176_v55  ;;  %v3304_v61 = vadd.f32 %v3303_v14, %v3176_v55  ;;  %v2952_v28 = vmul.f32 %v5269_v31, %v5269_v31  ;;  %v3112_v52 = vmul.f32 %v5271_v29, %v5271_v29 }
 0x25d   :  { %v3891_v43 = vpop.eup %3890  ;;  %vm3019_vm9 = vcmp.eq.f32.partialorder %v5279_v47, inf  ;;  %vm3021_vm10 = vcmp.eq.f32.partialorder %v5279_v47, 0.0  ;;  %3898 = vrsqrt.f32 %v5340_v38  ;;  %v3022_v54 = vand.u32 2147483648, %v5279_v47 }
 0x25e   :  { %v5336_v46 = vpop.f32.mrb[24].mxu0  ;;  %v5338_v20 = vpop.f32.mrb[24].mxu1  ;;  %v3268_v1 = vmul.f32 %v3252_v7, %v3252_v7  ;;  %v3018_v62 = vmul.f32 %v3891_v43, %v5279_v47  ;;  %3900 = vrsqrt.f32 %v5342_v12  ;;  %vm3179_vm11 = vcmp.eq.f32.partialorder %v5281_v0, inf }
 0x25f   :  { %v5346_v4 = vpop.f32.mrb[25].mxu0  ;;  %v5348_v8 = vpop.f32.mrb[25].mxu1  ;;  %vm3181_vm12 = vcmp.eq.f32.partialorder %v5281_v0, 0.0  ;;  %v5367_v29 = vadd.f32 %v2952_v28, %v2936_v58  ;;  %v3182_v21 = vand.u32 2147483648, %v5281_v0  ;;  %v5379_v27 = vadd.f32 %v3112_v52, %v3096_v5 }
 0x260   :  { %v3893_v53 = vpop.eup %3892  ;;  %v5373_v18 = vadd.f32 %v3282_v40, %v3268_v1  ;;  %v3020_v16 = vsel %vm3019_vm9, %v5279_v47, %v3018_v62  ;;  %vm3026_vm13 = vcmp.eq.f32.partialorder %v5286_v56, inf  ;;  %vm3028_vm14 = vcmp.eq.f32.partialorder %v5286_v56, 0.0 }
 0x261   :  { %v3178_v31 = vmul.f32 %v3893_v53, %v5281_v0  ;;  %v3895_v24 = vpop.eup %3894  ;;  %v3023_v23 = vsel %vm3021_vm10, %v3022_v54, %v3020_v16  ;;  %3902 = vrsqrt.f32 %v5367_v29  ;;  %v2937_v49 = vmul.f32 %v5288_v9, %v5288_v9 }
 0x262   :  { %v5360_v63 = vpop.f32.mrb[26].mxu0  ;;  %v5362_v60 = vpop.f32.mrb[26].mxu1  ;;  %v3025_v11 = vmul.f32 %v3895_v24, %v5286_v56  ;;  %3904 = vrsqrt.f32 %v5379_v27  ;;  %v3029_v15 = vand.u32 2147483648, %v5286_v56  ;;  %vm3186_vm15 = vcmp.eq.f32.partialorder %v5322_v13, inf }
 0x263   :  { %v5369_v19 = vpop.f32.mrb[27].mxu0  ;;  %v5371_v37 = vpop.f32.mrb[27].mxu1  ;;  %v3180_v39 = vsel %vm3179_vm11, %v5281_v0, %v3178_v31  ;;  %vm3188_vm0 = vcmp.eq.f32.partialorder %v5322_v13, 0.0  ;;  %v3189_v9 = vand.u32 2147483648, %v5322_v13  ;;  %vm3033_vm1 = vcmp.eq.f32.partialorder %v5340_v38, inf }
 0x264   :  { %v3183_v10 = vsel %vm3181_vm12, %v3182_v21, %v3180_v39  ;;  %v3027_v0 = vsel %vm3026_vm13, %v5286_v56, %v3025_v11  ;;  %v3897_v45 = vpop.eup %3896  ;;  %v3097_v35 = vmul.f32 %v5290_v17, %v5290_v17  ;;  %v2953_v51 = vmul.f32 %v5296_v25, %v5296_v25 }
 0x265   :  { %v3253_v47 = vsub.f32 %v3023_v23, %v3183_v10  ;;  %v3305_v41 = vadd.f32 %v3304_v61, %v3183_v10  ;;  %v3185_v57 = vmul.f32 %v3897_v45, %v5322_v13  ;;  %v3030_v48 = vsel %vm3028_vm14, %v3029_v15, %v3027_v0 }
 0x266   :  { %v5390_v42 = vpop.f32.mrb[28].mxu0  ;;  %v5392_v33 = vpop.f32.mrb[28].mxu1  ;;  %v3113_v22 = vmul.f32 %v5298_v2, %v5298_v2  ;;  %v2938_v34 = vmul.f32 %v5309_v26, %v5309_v26  ;;  %v2954_v40 = vmul.f32 %v5317_v59, %v5317_v59  ;;  %vm3035_vm2 = vcmp.eq.f32.partialorder %v5340_v38, 0.0 }
 0x267   :  { %v5396_v3 = vpop.f32.mrb[29].mxu0  ;;  %v5398_v14 = vpop.f32.mrb[29].mxu1  ;;  %v3187_v36 = vsel %vm3186_vm15, %v5322_v13, %v3185_v57  ;;  %v3036_v56 = vand.u32 2147483648, %v5340_v38  ;;  %v5425_v25 = vadd.f32 %v2953_v51, %v2937_v49  ;;  %vm3193_vm3 = vcmp.eq.f32.partialorder %v5342_v12, inf }
 0x268   :  { %v3899_v17 = vpop.eup %3898  ;;  %v3190_v59 = vsel %vm3188_vm0, %v3189_v9, %v3187_v36  ;;  %v5434_v55 = vadd.f32 %v3113_v22, %v3097_v35  ;;  %v5436_v5 = vadd.f32 %v2954_v40, %v2938_v34  ;;  %vm3195_vm4 = vcmp.eq.f32.partialorder %v5342_v12, 0.0 }
 0x269   :  { %v3901_v26 = vpop.eup %3900  ;;  %v3032_v58 = vmul.f32 %v3899_v17, %v5340_v38  ;;  %v3254_v7 = vsub.f32 %v3030_v48, %v3190_v59  ;;  %v5438_v61 = vadd.f32 %v3305_v41, %v3190_v59  ;;  %3906 = vrsqrt.f32 %v5425_v25 }
 0x26a   :  { %v5418_v32 = vpop.f32.mrb[30].mxu0  ;;  %v5420_v50 = vpop.f32.mrb[30].mxu1  ;;  %v3192_v28 = vmul.f32 %v3901_v26, %v5342_v12  ;;  %v3098_v13 = vmul.f32 %v5311_v30, %v5311_v30  ;;  %v3114_v52 = vmul.f32 %v5319_v44, %v5319_v44  ;;  %v3196_v1 = vand.u32 2147483648, %v5342_v12 }
 0x26b   :  { %v5427_v2 = vpop.f32.mrb[31].mxu0  ;;  %v5429_v6 = vpop.f32.mrb[31].mxu1  ;;  %v3034_v53 = vsel %vm3033_vm1, %v5340_v38, %v3032_v58  ;;  %vm3040_vm5 = vcmp.eq.f32.partialorder %v5367_v29, inf  ;;  %3908 = vrsqrt.f32 %v5434_v55  ;;  %v5454_v62 = vmul.f32 %v3253_v47, %v3253_v47 }
 0x26c   :  { %v3903_v43 = vpop.eup %3902  ;;  %v3043_v54 = vand.u32 2147483648, %v5367_v29  ;;  %vm3200_vm6 = vcmp.eq.f32.partialorder %v5379_v27, inf  ;;  %v3203_v30 = vand.u32 2147483648, %v5379_v27  ;;  %v3194_v31 = vsel %vm3193_vm3, %v5342_v12, %v3192_v28 }
 0x26d   :  { %v3905_v44 = vpop.eup %3904  ;;  %v3050_v24 = vand.u32 2147483648, %v5425_v25  ;;  %3910 = vrsqrt.f32 %v5436_v5  ;;  %v2939_v16 = vmul.f32 %v5336_v46, %v5336_v46  ;;  %v5464_v21 = vmul.f32 %v3254_v7, %v3254_v7 }
 0x26e   :  { %v5468_v23 = vsel %vm3035_vm2, %v3036_v56, %v3034_v53  ;;  %v3039_v39 = vmul.f32 %v3903_v43, %v5367_v29  ;;  %v5471_v11 = vadd.f32 %v3114_v52, %v3098_v13  ;;  %v3199_v10 = vmul.f32 %v3905_v44, %v5379_v27 }
 0x26f   :  { %v3099_v49 = vmul.f32 %v5338_v20, %v5338_v20  ;;  %v2955_v47 = vmul.f32 %v5346_v4, %v5346_v4  ;;  %v3115_v46 = vmul.f32 %v5348_v8, %v5348_v8  ;;  %v5482_v38 = vsel %vm3195_vm4, %v3196_v1, %v3194_v31 }
 0x270   :  { %vm3047_vm7 = vcmp.eq.f32.partialorder %v5425_v25, inf  ;;  %v3210_v41 = vand.u32 2147483648, %v5434_v55  ;;  %3912 = vrsqrt.f32 %v5471_v11  ;;  %v2940_v0 = vmul.f32 %v5360_v63, %v5360_v63 }
 0x271   :  { %vm3054_vm8 = vcmp.eq.f32.partialorder %v5436_v5, inf  ;;  %v5490_v20 = vadd.f32 %v2955_v47, %v2939_v16  ;;  %v5492_v4 = vadd.f32 %v3115_v46, %v3099_v49  ;;  %v3100_v12 = vmul.f32 %v5362_v60, %v5362_v60 }
 0x272   :  { %v3041_v8 = vsel %vm3040_vm5, %v5367_v29, %v3039_v39  ;;  %vm3042_vm9 = vcmp.eq.f32.partialorder %v5367_v29, 0.0  ;;  %vm3207_vm10 = vcmp.eq.f32.partialorder %v5434_v55, inf  ;;  %v3057_v45 = vand.u32 2147483648, %v5436_v5 }
 0x273   :  { %v2956_v63 = vmul.f32 %v5369_v19, %v5369_v19  ;;  %v3116_v15 = vmul.f32 %v5371_v37, %v5371_v37  ;;  %v3907_v9 = vpop.eup %3906  ;;  %v3201_v60 = vsel %vm3200_vm6, %v5379_v27, %v3199_v10  ;;  %vm3049_vm11 = vcmp.eq.f32.partialorder %v5425_v25, 0.0 }
 0x274   :  { %3914 = vrsqrt.f32 %v5490_v20  ;;  %v2941_v57 = vmul.f32 %v5390_v42, %v5390_v42  ;;  %v3101_v35 = vmul.f32 %v5392_v33, %v5392_v33  ;;  %v3046_v19 = vmul.f32 %v3907_v9, %v5425_v25 }
 0x275   :  { %vm3056_vm12 = vcmp.eq.f32.partialorder %v5436_v5, 0.0  ;;  %vm3214_vm13 = vcmp.eq.f32.partialorder %v5471_v11, inf  ;;  %3916 = vrsqrt.f32 %v5492_v4  ;;  %v5519_v37 = vadd.f32 %v2956_v63, %v2940_v0  ;;  %v3909_v51 = vpop.eup %3908 }
 0x276   :  { %v5521_v48 = vadd.f32 %v3116_v15, %v3100_v12  ;;  %v2957_v22 = vmul.f32 %v5396_v3, %v5396_v3  ;;  %v3117_v42 = vmul.f32 %v5398_v14, %v5398_v14  ;;  %v2942_v33 = vmul.f32 %v5418_v32, %v5418_v32 }
 0x277   :  { %vm3202_vm14 = vcmp.eq.f32.partialorder %v5379_v27, 0.0  ;;  %v3206_v34 = vmul.f32 %v3909_v51, %v5434_v55  ;;  %v3217_v40 = vand.u32 2147483648, %v5471_v11  ;;  %3918 = vrsqrt.f32 %v5519_v37  ;;  %v3911_v36 = vpop.eup %3910 }
 0x278   :  { %v3102_v17 = vmul.f32 %v5420_v50, %v5420_v50  ;;  %vm3209_vm15 = vcmp.eq.f32.partialorder %v5434_v55, 0.0  ;;  %vm3216_vm0 = vcmp.eq.f32.partialorder %v5471_v11, 0.0  ;;  %3920 = vrsqrt.f32 %v5521_v48 }
 0x279   :  { %v5538_v3 = vadd.f32 %v2957_v22, %v2941_v57  ;;  %v5540_v14 = vadd.f32 %v3117_v42, %v3101_v35  ;;  %v2958_v32 = vmul.f32 %v5427_v2, %v5427_v2  ;;  %v3053_v56 = vmul.f32 %v3911_v36, %v5436_v5 }
 0x27a   :  { %vm3061_vm1 = vcmp.eq.f32.partialorder %v5490_v20, inf  ;;  %v3064_v50 = vand.u32 2147483648, %v5490_v20  ;;  %v3118_v26 = vmul.f32 %v5429_v6, %v5429_v6  ;;  %v3048_v59 = vsel %vm3047_vm7, %v5425_v25, %v3046_v19  ;;  %v3913_v2 = vpop.eup %3912 }
 0x27b   :  { %vm3221_vm2 = vcmp.eq.f32.partialorder %v5492_v4, inf  ;;  %3922 = vrsqrt.f32 %v5538_v3  ;;  %v5554_v58 = vadd.f32 %v2958_v32, %v2942_v33  ;;  %v3055_v7 = vsel %vm3054_vm8, %v5436_v5, %v3053_v56 }
 0x27c   :  { %v3224_v28 = vand.u32 2147483648, %v5492_v4  ;;  %3924 = vrsqrt.f32 %v5540_v14  ;;  %v5561_v6 = vadd.f32 %v3118_v26, %v3102_v17  ;;  %v3208_v13 = vsel %vm3207_vm10, %v5434_v55, %v3206_v34 }
 0x27d   :  { %v3213_v52 = vmul.f32 %v3913_v2, %v5471_v11  ;;  %3926 = vrsqrt.f32 %v5554_v58  ;;  %v3044_v43 = vsel %vm3042_vm9, %v3043_v54, %v3041_v8  ;;  %v3051_v53 = vsel %vm3049_vm11, %v3050_v24, %v3048_v59 }
 0x27e   :  { %3928 = vrsqrt.f32 %v5561_v6  ;;  %vm3063_vm3 = vcmp.eq.f32.partialorder %v5490_v20, 0.0  ;;  %vm3068_vm4 = vcmp.eq.f32.partialorder %v5519_v37, inf  ;;  %v3915_v1 = vpop.eup %3914  ;;  %v3058_v29 = vsel %vm3056_vm12, %v3057_v45, %v3055_v7 }
 0x27f   :  { %v3215_v44 = vsel %vm3214_vm13, %v5471_v11, %v3213_v52  ;;  %vm3070_vm5 = vcmp.eq.f32.partialorder %v5519_v37, 0.0  ;;  %v3071_v54 = vand.u32 2147483648, %v5519_v37  ;;  %v3917_v31 = vpop.eup %3916  ;;  %v3060_v25 = vmul.f32 %v3915_v1, %v5490_v20 }
 0x280   :  { %vm3075_vm6 = vcmp.eq.f32.partialorder %v5538_v3, inf  ;;  %vm3077_vm7 = vcmp.eq.f32.partialorder %v5538_v3, 0.0  ;;  %v3078_v24 = vand.u32 2147483648, %v5538_v3  ;;  %v3220_v16 = vmul.f32 %v3917_v31, %v5492_v4 }
 0x281   :  { %vm3082_vm8 = vcmp.eq.f32.partialorder %v5554_v58, inf  ;;  %v3085_v5 = vand.u32 2147483648, %v5554_v58  ;;  %v3204_v39 = vsel %vm3202_vm14, %v3203_v30, %v3201_v60  ;;  %v3919_v10 = vpop.eup %3918  ;;  %v3062_v49 = vsel %vm3061_vm1, %v5490_v20, %v3060_v25 }
 0x282   :  { %vm3084_vm9 = vcmp.eq.f32.partialorder %v5554_v58, 0.0  ;;  %v3211_v47 = vsel %vm3209_vm15, %v3210_v41, %v3208_v13  ;;  %v3218_v46 = vsel %vm3216_vm0, %v3217_v40, %v3215_v44  ;;  %vm3223_vm10 = vcmp.eq.f32.partialorder %v5492_v4, 0.0  ;;  %v3921_v0 = vpop.eup %3920 }
 0x283   :  { %v3067_v27 = vmul.f32 %v3919_v10, %v5519_v37  ;;  %v3222_v30 = vsel %vm3221_vm2, %v5492_v4, %v3220_v16  ;;  %vm3228_vm11 = vcmp.eq.f32.partialorder %v5521_v48, inf  ;;  %vm3230_vm12 = vcmp.eq.f32.partialorder %v5521_v48, 0.0 }
 0x284   :  { %v3227_v12 = vmul.f32 %v3921_v0, %v5521_v48  ;;  %v3065_v55 = vsel %vm3063_vm3, %v3064_v50, %v3062_v49  ;;  %v3231_v11 = vand.u32 2147483648, %v5521_v48  ;;  %vm3235_vm13 = vcmp.eq.f32.partialorder %v5540_v14, inf }
 0x285   :  { %v3923_v41 = vpop.eup %3922  ;;  %v3069_v8 = vsel %vm3068_vm4, %v5519_v37, %v3067_v27  ;;  %v3225_v45 = vsel %vm3223_vm10, %v3224_v28, %v3222_v30  ;;  %v3238_v4 = vand.u32 2147483648, %v5540_v14  ;;  %v3255_v63 = vsub.f32 %v5468_v23, %v5482_v38 }
 0x286   :  { %v3925_v15 = vpop.eup %3924  ;;  %v3072_v20 = vsel %vm3070_vm5, %v3071_v54, %v3069_v8  ;;  %v3074_v9 = vmul.f32 %v3923_v41, %v5538_v3  ;;  %v3229_v60 = vsel %vm3228_vm11, %v5521_v48, %v3227_v12  ;;  %v3256_v57 = vsub.f32 %v3044_v43, %v3204_v39 }
 0x287   :  { %v3927_v35 = vpop.eup %3926  ;;  %v3232_v19 = vsel %vm3230_vm12, %v3231_v11, %v3229_v60  ;;  %v3234_v51 = vmul.f32 %v3925_v15, %v5540_v14  ;;  %v3257_v22 = vsub.f32 %v3051_v53, %v3211_v47  ;;  %v3258_v42 = vsub.f32 %v3058_v29, %v3218_v46 }
 0x288   :  { %v3929_v33 = vpop.eup %3928  ;;  %v3076_v23 = vsel %vm3075_vm6, %v5538_v3, %v3074_v9  ;;  %v3081_v37 = vmul.f32 %v3927_v35, %v5554_v58  ;;  %v3259_v34 = vsub.f32 %v3065_v55, %v3225_v45  ;;  %v3260_v40 = vsub.f32 %v3072_v20, %v3232_v19 }
 0x289   :  { %v3079_v17 = vsel %vm3077_vm7, %v3078_v24, %v3076_v23  ;;  %v3236_v48 = vsel %vm3235_vm13, %v5540_v14, %v3234_v51  ;;  %vm3237_vm14 = vcmp.eq.f32.partialorder %v5540_v14, 0.0  ;;  %v3241_v36 = vmul.f32 %v3929_v33, %v5561_v6 }
 0x28a   :  { %v3083_v32 = vsel %vm3082_vm8, %v5554_v58, %v3081_v37  ;;  %v3239_v56 = vsel %vm3237_vm14, %v3238_v4, %v3236_v48  ;;  %vm3242_vm15 = vcmp.eq.f32.partialorder %v5561_v6, inf  ;;  %v3245_v50 = vand.u32 2147483648, %v5561_v6 }
 0x28b   :  { %v3086_v3 = vsel %vm3084_vm9, %v3085_v5, %v3083_v32  ;;  %v3243_v26 = vsel %vm3242_vm15, %v5561_v6, %v3241_v36  ;;  %vm3244_vm0 = vcmp.eq.f32.partialorder %v5561_v6, 0.0  ;;  %v3261_v59 = vsub.f32 %v3079_v17, %v3239_v56 }
 0x28c   :  { %v3246_v14 = vsel %vm3244_vm0, %v3245_v50, %v3243_v26  ;;  %v3271_v2 = vmul.f32 %v3255_v63, %v3255_v63  ;;  %v3284_v7 = vadd.f32 %v5373_v18, %v5454_v62  ;;  %v3307_v13 = vadd.f32 %v5438_v61, %v5482_v38 }
 0x28d   :  { %v3262_v28 = vsub.f32 %v3086_v3, %v3246_v14  ;;  %v3272_v52 = vmul.f32 %v3256_v57, %v3256_v57  ;;  %v3273_v58 = vmul.f32 %v3257_v22, %v3257_v22  ;;  %v3274_v29 = vmul.f32 %v3258_v42, %v3258_v42 }
 0x28e   :  { %v3285_v43 = vadd.f32 %v3284_v7, %v5464_v21  ;;  %v3308_v53 = vadd.f32 %v3307_v13, %v3204_v39  ;;  %v3275_v31 = vmul.f32 %v3259_v34, %v3259_v34  ;;  %v3276_v16 = vmul.f32 %v3260_v40, %v3260_v40 }
 0x28f   :  { %v3277_v62 = vmul.f32 %v3261_v59, %v3261_v59  ;;  %v3278_v61 = vmul.f32 %v3262_v28, %v3262_v28 }
 0x290   :  { %v3286_v1 = vadd.f32 %v3285_v43, %v3271_v2  ;;  %v3309_v44 = vadd.f32 %v3308_v53, %v3211_v47 }
 0x292   :  { %v3287_v54 = vadd.f32 %v3286_v1, %v3272_v52  ;;  %v3310_v6 = vadd.f32 %v3309_v44, %v3218_v46 }
 0x294   :  { %v3288_v25 = vadd.f32 %v3287_v54, %v3273_v58  ;;  %v3311_v24 = vadd.f32 %v3310_v6, %v3225_v45 }
 0x296   :  { %v3289_v5 = vadd.f32 %v3288_v25, %v3274_v29  ;;  %v3312_v18 = vadd.f32 %v3311_v24, %v3232_v19 }
 0x298   :  { %v3290_v10 = vadd.f32 %v3289_v5, %v3275_v31  ;;  %v3313_v49 = vadd.f32 %v3312_v18, %v3239_v56 }
 0x29a   :  { %v3291_v38 = vadd.f32 %v3290_v10, %v3276_v16  ;;  %v3314_v0 = vadd.f32 %v3313_v49, %v3246_v14 }
 0x29c   :  { %v3292_v21 = vadd.f32 %v3291_v38, %v3277_v62  ;;  %v3315_v39 = vrot.slane %v3314_v0, 4 }
 0x29e   :  { %v3293_v27 = vadd.f32 %v3292_v21, %v3278_v61  ;;  %v3316_v30 = vadd.f32 %v3315_v39, %v3314_v0 }
 0x2a0   :  { %v3294_v47 = vrot.slane %v3293_v27, 4  ;;  %v3317_v12 = vrot.slane %v3316_v30, 2 }
 0x2a2   :  { %v3295_v55 = vadd.f32 %v3294_v47, %v3293_v27  ;;  %v3318_v46 = vadd.f32 %v3317_v12, %v3316_v30 }
 0x2a4   :  { %v3296_v11 = vrot.slane %v3295_v55, 2  ;;  %v3319_v41 = vrot.slane %v3318_v46, 1 }
 0x2a6   :  { %v3297_v8 = vadd.f32 %v3296_v11, %v3295_v55  ;;  %v3320_v45 = vadd.f32 %v3319_v41, %v3318_v46 }
 0x2a8   :  { %v3298_v4 = vrot.slane %v3297_v8, 1  ;;  %3322 = vst [vmem:[#allocation4] sm:$0x1] %v3320_v45 }
 0x2aa   :  { %v3299_v63 = vadd.f32 %v3298_v4, %v3297_v8 }
 0x2ab   :  { %3941 = shalt.err (!%p3938_p4)
}
 0x2ac   :  { %s3942_s10 = scalar_lea.hbm %s5693_s4, 16 }
 0x2ad   :  { %p3943_p5 = scmp.ne.s32.totalorder %s5693_s4, %s3942_s10  ;;  %p3946_p6 = scmp.lt.u32.totalorder %s3942_s10, %s5693_s4 }
 0x2af   :  { %p3948_p7 = pnand %p3946_p6, %p3943_p5 }
 0x2b1   :  { %3951 = shalt.err (!%p3948_p7)
}
 0x2b2   :  { %3342 = dma.vmem_to_hbm [thread:$0]  %s3340_s1, 16, %s5693_s4, [#allocation5]   ;;  %3321 = vst [vmem:[#allocation2] sm:$0x1] %v3299_v63 }
 0x2b3   :  { %s3952_s17 = scalar_lea.vmem %s5657_s5, 16  ;;  %s3956_s18 = scalar_lea.vmem %s5657_s5, 32 }
 0x2b4   :  { %p3953_p8 = scmp.ne.s32.totalorder %s5657_s5, %s3952_s17  ;;  %p3957_p9 = scmp.lt.s32.totalorder %s5657_s5, %s5657_s5 }
 0x2b5   :  { %p3958_p10 = scmp.lt.s32.totalorder %s3956_s18, %s3952_s17 }
 0x2b7   :  { %p3959_p11 = por %p3958_p10, %p3957_p9 }
 0x2b9   :  { %p3960_p12 = pnand %p3959_p11, %p3953_p8 }
 0x2bb   :  { %3963 = shalt.err (!%p3960_p12)
}
 0x2bc   :  { %s3964_s21 = scalar_lea.hbm %s5692_s3, 16 }
 0x2bd   :  { %p3965_p13 = scmp.ne.s32.totalorder %s5692_s3, %s3964_s21  ;;  %p3968_p0 = scmp.lt.u32.totalorder %s3964_s21, %s5692_s3 }
 0x2bf   :  { %p3970_p1 = pnand %p3968_p0, %p3965_p13 }
 0x2c1   :  { %3973 = shalt.err (!%p3970_p1)
}
 0x2c2   :  { %3332 = dma.vmem_to_hbm [thread:$0]  %s5657_s5, 16, %s5692_s3, [#allocation3]  }
 0x2c3   :  { %3974 = dma.done.wait [#allocation3], 16  }
 0x2c4   :  { %3975 = vsyncadd [#allocation3], 4294967280 }
 0x2c5   :  { %3976 = dma.done.wait [#allocation5], 16  }
 0x2c6   :  { %3977 = vsyncadd [#allocation5], 4294967280 }
 0x2c7   :  { %3349 = vsyncpa [#allocation3], 1 }
 0x2c8   :  { %3350 = vsyncpa [#allocation5], 1 }

</bundles_post_ra>
